<compile_context>
chip_gen: v5e
topology: v5e:2x2
jax: 0.10.0
libtpu: 0.0.40
codegen_flags: <defaults>
</compile_context>

<pallas_src>
import functools

import jax
import jax.numpy as jnp
from jax.experimental import pallas as pl
from jax.experimental.pallas import tpu as pltpu


def _round_up(v, m):
    return (v + m - 1) // m * m


def _output_kernel(x_ref, w_ref, o_ref, buf_ref, col_ref, *,
                   bt, num_groups, cpg, inv_count, gn_eps, wp, s_out_pad):
    """Fused GroupNorm(rms) -> SiLU -> 3x3 conv for `bt` images.

    x_ref  : (bt, C, S_pad)       f32  zero-padded, spatially flattened input
    w_ref  : (O, 9*C)             bf16 L2-normalized conv weight, tap-major cols
    o_ref  : (bt, O, S_out_pad)   f32  extended conv output (junk cols sliced off
                                       in the wrapper)
    buf_ref: (C, S_pad)           bf16 scratch: SiLU(GroupNorm(x)), one image
    col_ref: (9*C, S_out_pad)     bf16 scratch: im2col matrix, one image
    """
    C = buf_ref.shape[0]
    w = w_ref[...]                                            # (O, 9C) bf16, hoisted

    # Channel-row iota used to scatter per-group scalars into a (C, 1) vector.
    row = jax.lax.broadcasted_iota(jnp.int32, (C, 1), 0)

    for b in range(bt):                                       # static unroll
        a = x_ref[b]                                          # (C, S_pad) f32

        # ---- GroupNorm (RMS over each group; eps added AFTER the sqrt) ----
        # Padding zeros add nothing to the sums; the static inv_count uses the
        # real (unpadded) element count, so statistics are exact.
        ss = jnp.sum(a * a, axis=1, keepdims=True)            # (C, 1) per channel
        denom = jnp.zeros((C, 1), jnp.float32)
        for g in range(num_groups):                           # static, tiny work
            tot = jnp.sum(ss[g * cpg:(g + 1) * cpg, :],
                          axis=0, keepdims=True)              # (1, 1) group total
            d_g = jnp.sqrt(tot * inv_count) + gn_eps          # (1, 1)
            in_group = (row >= g * cpg) & (row < (g + 1) * cpg)
            denom = jnp.where(in_group, d_g, denom)           # fill group's rows
        inv = pl.reciprocal(denom, approx=True)               # (C, 1), EUP slot
        y = a * inv                                           # (C, S_pad)

        # ---- SiLU (EUP exp + approx reciprocal; no full-slab f32 divide) ---
        y = y * pl.reciprocal(1.0 + jnp.exp(-y), approx=True)
        buf_ref[...] = y.astype(buf_ref.dtype)                # bf16, zero pad stays 0

        # ---- im2col: 9 statically shifted windows -> (9C, S_out_pad) -------
        # Offsets dy*Wp+dx are static but lane-unaligned (Wp is not a multiple
        # of 128); each window is read exactly once here so the MXU below only
        # sees aligned, lane-dense operands.
        for k in range(9):                                    # static unroll
            ofs = (k // 3) * wp + (k % 3)
            col_ref[k * C:(k + 1) * C, :] = buf_ref[:, ofs:ofs + s_out_pad]

        # ---- one fused bf16 MXU matmul, f32 accumulation --------------------
        o_ref[b] = jnp.dot(w, col_ref[...],
                           preferred_element_type=jnp.float32)


def _pick_block_batch(n):
    """Images per grid step: amortize per-step overhead for large N, keep the
    grid length even (both v7x TensorCores busy) when possible."""
    if n <= 2:
        return 1
    for bt in (8, 4, 2):
        if n % bt == 0 and (n // bt) % 2 == 0:
            return bt
    for bt in (8, 4, 2):
        if n % bt == 0:
            return bt
    return 1


def output_forward(x, weight, *, num_groups, gn_eps=1e-4, wn_eps=1e-4):
    """Pallas implementation of Output.forward.  x: (N,C,H,W), weight: (O,C,3,3)."""
    N, C, H, W = x.shape
    O = weight.shape[0]
    assert weight.shape == (O, C, 3, 3)
    assert C % num_groups == 0
    cpg = C // num_groups

    Wp = W + 2                          # padded row width (1 left + 1 right)
    S = (H + 3) * Wp                    # 1 top + 2 bottom zero rows (shift headroom)
    S_out = H * Wp                      # real extended output length
    S_out_pad = _round_up(max(S_out, 128), 128)              # lane-dense output
    S_pad = _round_up(max(S, 2 * Wp + 2 + S_out_pad), 128)   # windows stay in-bounds

    bt = _pick_block_batch(N)

    # ---- layout plumbing in XLA (pad / reshape / transpose are cheap) ------
    xp = jnp.pad(x.astype(jnp.float32), ((0, 0), (0, 0), (1, 2), (1, 1)))
    x_flat = xp.reshape(N, C, S)
    x_flat = jnp.pad(x_flat, ((0, 0), (0, 0), (0, S_pad - S)))

    # F.normalize(weight, p=2, dim=1, eps): unit L2 norm per (o, kh, kw).
    w = weight.astype(jnp.float32)
    col_norm = jnp.sqrt(jnp.sum(w * w, axis=1, keepdims=True))       # (O,1,3,3)
    w = w / jnp.maximum(col_norm, wn_eps)
    # w_mat[o, (dy*3+dx)*C + c] = w[o, c, dy, dx]  — matches im2col row blocks.
    w_mat = jnp.transpose(w, (0, 2, 3, 1)).reshape(O, 9 * C).astype(jnp.bfloat16)

    kernel = functools.partial(
        _output_kernel,
        bt=bt, num_groups=num_groups, cpg=cpg,
        inv_count=1.0 / float(cpg * H * W),
        gn_eps=float(gn_eps), wp=Wp, s_out_pad=S_out_pad)

    cost = pl.CostEstimate(
        flops=N * (2 * O * 9 * C * S_out_pad + 12 * C * S_pad),
        transcendentals=2 * N * C * S_pad,
        bytes_accessed=(4 * x_flat.size + 2 * w_mat.size + 4 * N * O * S_out_pad))

    out_ext = pl.pallas_call(
        kernel,
        out_shape=jax.ShapeDtypeStruct((N, O, S_out_pad), jnp.float32),
        grid=(N // bt,),
        in_specs=[
            pl.BlockSpec((bt, C, S_pad), lambda n: (n, 0, 0)),
            pl.BlockSpec((O, 9 * C), lambda n: (0, 0)),
        ],
        out_specs=pl.BlockSpec((bt, O, S_out_pad), lambda n: (n, 0, 0)),
        scratch_shapes=[
            pltpu.VMEM((C, S_pad), jnp.bfloat16),           # SiLU(GN(x))
            pltpu.VMEM((9 * C, S_out_pad), jnp.bfloat16),   # im2col
        ],
        compiler_params=pltpu.CompilerParams(
            dimension_semantics=("parallel",)),
        cost_estimate=cost,
    )(x_flat, w_mat)

    # Drop the padded tail and the 2 junk columns per extended row.
    return out_ext[:, :, :S_out].reshape(N, O, H, Wp)[:, :, :, :W]


def _reference(x, weight, *, num_groups, gn_eps=1e-4, wn_eps=1e-4):
    """Pure-JAX f32 reference matching the PyTorch module."""
    N, C, H, W = x.shape
    cpg = C // num_groups
    xg = x.reshape(N, num_groups, cpg, H, W)
    ms = jnp.mean(xg * xg, axis=(2, 3, 4), keepdims=True)
    y = (xg / (jnp.sqrt(ms) + gn_eps)).reshape(N, C, H, W)
    y = y * (1.0 / (1.0 + jnp.exp(-y)))
    col_norm = jnp.sqrt(jnp.sum(weight * weight, axis=1, keepdims=True))
    wn = weight / jnp.maximum(col_norm, wn_eps)
    return jax.lax.conv_general_dilated(
        y, wn, window_strides=(1, 1), padding=((1, 1), (1, 1)),
        dimension_numbers=("NCHW", "OIHW", "NCHW"),
        precision=jax.lax.Precision.HIGHEST)


if __name__ == "__main__":
    key = jax.random.PRNGKey(0)
    kx, kw = jax.random.split(key)

    # Small shapes consistent with the module: batch=2, in_channels=32
    # (divisible by num_groups=8), spatial=16x16, out_channels=16.
    N, C, H, W = 2, 32, 16, 16
    O, G = 16, 8
    x = jax.random.normal(kx, (N, C, H, W), dtype=jnp.float32)
    weight = jax.random.normal(kw, (O, C, 3, 3), dtype=jnp.float32)  # nn.init.normal_

    out = jax.block_until_ready(output_forward(x, weight, num_groups=G))
    ref = _reference(x, weight, num_groups=G)

    assert out.shape == (N, O, H, W) and out.dtype == jnp.float32
    # bf16 matmul operands + EUP approx reciprocals => slightly looser tolerance
    # than a pure-f32 kernel; structural/indexing bugs would be O(0.3+) off.
    assert bool(jnp.allclose(out, ref, rtol=5e-2, atol=5e-2)), (
        f"max abs error {float(jnp.max(jnp.abs(out - ref)))}")
    print("KERNEL_OK")
</pallas_src>

<mosaic_0001>
module attributes {stable_mosaic.version = 11 : i64} {
  func.func @_output_kernel(%arg0: i32, %arg1: memref<1x32x512xf32, #tpu.memory_space<vmem>>, %arg2: memref<16x288xbf16, #tpu.memory_space<vmem>>, %arg3: memref<1x16x384xf32, #tpu.memory_space<vmem>>, %arg4: memref<32x512xbf16, #tpu.memory_space<vmem>>, %arg5: memref<288x384xbf16, #tpu.memory_space<vmem>>) attributes {dimension_semantics = [#tpu.dimension_semantics<parallel>], iteration_bounds = array<i64: 2>, scalar_prefetch = 0 : i64, scratch_operands = 2 : i64, tpu.core_type = #tpu.core_type<tc>, window_params = [{transform_indices = @transform_0, window_bounds = array<i64: 1, 32, 512>}, {pipeline_mode = #tpu.pipeline_mode<synchronous>, transform_indices = @transform_1, window_bounds = array<i64: 16, 288>}, {transform_indices = @transform_2, window_bounds = array<i64: 1, 16, 384>}]} {
    %c0 = arith.constant 0 : index
    %c0_0 = arith.constant 0 : index
    %0 = vector.load %arg2[%c0, %c0_0] : memref<16x288xbf16, #tpu.memory_space<vmem>>, vector<16x288xbf16>
    %1 = tpu.iota {dimensions = array<i32: 0>} : vector<32x1xi32>
    %c0_1 = arith.constant 0 : index
    %c0_2 = arith.constant 0 : index
    %c0_3 = arith.constant 0 : index
    %2 = vector.load %arg1[%c0_1, %c0_2, %c0_3] : memref<1x32x512xf32, #tpu.memory_space<vmem>>, vector<1x32x512xf32>
    %3 = vector.shape_cast %2 : vector<1x32x512xf32> to vector<32x512xf32>
    %4 = arith.mulf %3, %3 : vector<32x512xf32>
    %cst = arith.constant dense<0.000000e+00> : vector<32xf32>
    %5 = vector.multi_reduction <add>, %4, %cst [1] : vector<32x512xf32> to vector<32xf32>
    %6 = vector.shape_cast %5 : vector<32xf32> to vector<32x1xf32>
    %cst_4 = arith.constant 0.000000e+00 : f32
    %7 = vector.broadcast %cst_4 : f32 to vector<32x1xf32>
    %8 = vector.extract_strided_slice %6 {offsets = [0, 0], sizes = [4, 1], strides = [1, 1]} : vector<32x1xf32> to vector<4x1xf32>
    %cst_5 = arith.constant dense<0.000000e+00> : vector<1xf32>
    %9 = vector.multi_reduction <add>, %8, %cst_5 [0] : vector<4x1xf32> to vector<1xf32>
    %10 = vector.shape_cast %9 : vector<1xf32> to vector<1x1xf32>
    %cst_6 = arith.constant 9.765625E-4 : f32
    %11 = vector.broadcast %cst_6 : f32 to vector<1x1xf32>
    %12 = arith.mulf %10, %11 : vector<1x1xf32>
    %13 = math.sqrt %12 : vector<1x1xf32>
    %cst_7 = arith.constant 9.99999974E-5 : f32
    %14 = vector.broadcast %cst_7 : f32 to vector<1x1xf32>
    %15 = arith.addf %13, %14 : vector<1x1xf32>
    %c0_i32 = arith.constant 0 : i32
    %16 = vector.broadcast %c0_i32 : i32 to vector<32x1xi32>
    %17 = arith.cmpi sge, %1, %16 : vector<32x1xi32>
    %c4_i32 = arith.constant 4 : i32
    %18 = vector.broadcast %c4_i32 : i32 to vector<32x1xi32>
    %19 = arith.cmpi slt, %1, %18 : vector<32x1xi32>
    %20 = arith.andi %17, %19 : vector<32x1xi1>
    %21 = vector.shape_cast %15 : vector<1x1xf32> to vector<1x1xf32>
    %22 = vector.broadcast %21 : vector<1x1xf32> to vector<32x1xf32>
    %23 = arith.select %20, %22, %7 : vector<32x1xi1>, vector<32x1xf32>
    %24 = vector.extract_strided_slice %6 {offsets = [4, 0], sizes = [4, 1], strides = [1, 1]} : vector<32x1xf32> to vector<4x1xf32>
    %cst_8 = arith.constant dense<0.000000e+00> : vector<1xf32>
    %25 = vector.multi_reduction <add>, %24, %cst_8 [0] : vector<4x1xf32> to vector<1xf32>
    %26 = vector.shape_cast %25 : vector<1xf32> to vector<1x1xf32>
    %cst_9 = arith.constant 9.765625E-4 : f32
    %27 = vector.broadcast %cst_9 : f32 to vector<1x1xf32>
    %28 = arith.mulf %26, %27 : vector<1x1xf32>
    %29 = math.sqrt %28 : vector<1x1xf32>
    %cst_10 = arith.constant 9.99999974E-5 : f32
    %30 = vector.broadcast %cst_10 : f32 to vector<1x1xf32>
    %31 = arith.addf %29, %30 : vector<1x1xf32>
    %c4_i32_11 = arith.constant 4 : i32
    %32 = vector.broadcast %c4_i32_11 : i32 to vector<32x1xi32>
    %33 = arith.cmpi sge, %1, %32 : vector<32x1xi32>
    %c8_i32 = arith.constant 8 : i32
    %34 = vector.broadcast %c8_i32 : i32 to vector<32x1xi32>
    %35 = arith.cmpi slt, %1, %34 : vector<32x1xi32>
    %36 = arith.andi %33, %35 : vector<32x1xi1>
    %37 = vector.shape_cast %31 : vector<1x1xf32> to vector<1x1xf32>
    %38 = vector.broadcast %37 : vector<1x1xf32> to vector<32x1xf32>
    %39 = arith.select %36, %38, %23 : vector<32x1xi1>, vector<32x1xf32>
    %40 = vector.extract_strided_slice %6 {offsets = [8, 0], sizes = [4, 1], strides = [1, 1]} : vector<32x1xf32> to vector<4x1xf32>
    %cst_12 = arith.constant dense<0.000000e+00> : vector<1xf32>
    %41 = vector.multi_reduction <add>, %40, %cst_12 [0] : vector<4x1xf32> to vector<1xf32>
    %42 = vector.shape_cast %41 : vector<1xf32> to vector<1x1xf32>
    %cst_13 = arith.constant 9.765625E-4 : f32
    %43 = vector.broadcast %cst_13 : f32 to vector<1x1xf32>
    %44 = arith.mulf %42, %43 : vector<1x1xf32>
    %45 = math.sqrt %44 : vector<1x1xf32>
    %cst_14 = arith.constant 9.99999974E-5 : f32
    %46 = vector.broadcast %cst_14 : f32 to vector<1x1xf32>
    %47 = arith.addf %45, %46 : vector<1x1xf32>
    %c8_i32_15 = arith.constant 8 : i32
    %48 = vector.broadcast %c8_i32_15 : i32 to vector<32x1xi32>
    %49 = arith.cmpi sge, %1, %48 : vector<32x1xi32>
    %c12_i32 = arith.constant 12 : i32
    %50 = vector.broadcast %c12_i32 : i32 to vector<32x1xi32>
    %51 = arith.cmpi slt, %1, %50 : vector<32x1xi32>
    %52 = arith.andi %49, %51 : vector<32x1xi1>
    %53 = vector.shape_cast %47 : vector<1x1xf32> to vector<1x1xf32>
    %54 = vector.broadcast %53 : vector<1x1xf32> to vector<32x1xf32>
    %55 = arith.select %52, %54, %39 : vector<32x1xi1>, vector<32x1xf32>
    %56 = vector.extract_strided_slice %6 {offsets = [12, 0], sizes = [4, 1], strides = [1, 1]} : vector<32x1xf32> to vector<4x1xf32>
    %cst_16 = arith.constant dense<0.000000e+00> : vector<1xf32>
    %57 = vector.multi_reduction <add>, %56, %cst_16 [0] : vector<4x1xf32> to vector<1xf32>
    %58 = vector.shape_cast %57 : vector<1xf32> to vector<1x1xf32>
    %cst_17 = arith.constant 9.765625E-4 : f32
    %59 = vector.broadcast %cst_17 : f32 to vector<1x1xf32>
    %60 = arith.mulf %58, %59 : vector<1x1xf32>
    %61 = math.sqrt %60 : vector<1x1xf32>
    %cst_18 = arith.constant 9.99999974E-5 : f32
    %62 = vector.broadcast %cst_18 : f32 to vector<1x1xf32>
    %63 = arith.addf %61, %62 : vector<1x1xf32>
    %c12_i32_19 = arith.constant 12 : i32
    %64 = vector.broadcast %c12_i32_19 : i32 to vector<32x1xi32>
    %65 = arith.cmpi sge, %1, %64 : vector<32x1xi32>
    %c16_i32 = arith.constant 16 : i32
    %66 = vector.broadcast %c16_i32 : i32 to vector<32x1xi32>
    %67 = arith.cmpi slt, %1, %66 : vector<32x1xi32>
    %68 = arith.andi %65, %67 : vector<32x1xi1>
    %69 = vector.shape_cast %63 : vector<1x1xf32> to vector<1x1xf32>
    %70 = vector.broadcast %69 : vector<1x1xf32> to vector<32x1xf32>
    %71 = arith.select %68, %70, %55 : vector<32x1xi1>, vector<32x1xf32>
    %72 = vector.extract_strided_slice %6 {offsets = [16, 0], sizes = [4, 1], strides = [1, 1]} : vector<32x1xf32> to vector<4x1xf32>
    %cst_20 = arith.constant dense<0.000000e+00> : vector<1xf32>
    %73 = vector.multi_reduction <add>, %72, %cst_20 [0] : vector<4x1xf32> to vector<1xf32>
    %74 = vector.shape_cast %73 : vector<1xf32> to vector<1x1xf32>
    %cst_21 = arith.constant 9.765625E-4 : f32
    %75 = vector.broadcast %cst_21 : f32 to vector<1x1xf32>
    %76 = arith.mulf %74, %75 : vector<1x1xf32>
    %77 = math.sqrt %76 : vector<1x1xf32>
    %cst_22 = arith.constant 9.99999974E-5 : f32
    %78 = vector.broadcast %cst_22 : f32 to vector<1x1xf32>
    %79 = arith.addf %77, %78 : vector<1x1xf32>
    %c16_i32_23 = arith.constant 16 : i32
    %80 = vector.broadcast %c16_i32_23 : i32 to vector<32x1xi32>
    %81 = arith.cmpi sge, %1, %80 : vector<32x1xi32>
    %c20_i32 = arith.constant 20 : i32
    %82 = vector.broadcast %c20_i32 : i32 to vector<32x1xi32>
    %83 = arith.cmpi slt, %1, %82 : vector<32x1xi32>
    %84 = arith.andi %81, %83 : vector<32x1xi1>
    %85 = vector.shape_cast %79 : vector<1x1xf32> to vector<1x1xf32>
    %86 = vector.broadcast %85 : vector<1x1xf32> to vector<32x1xf32>
    %87 = arith.select %84, %86, %71 : vector<32x1xi1>, vector<32x1xf32>
    %88 = vector.extract_strided_slice %6 {offsets = [20, 0], sizes = [4, 1], strides = [1, 1]} : vector<32x1xf32> to vector<4x1xf32>
    %cst_24 = arith.constant dense<0.000000e+00> : vector<1xf32>
    %89 = vector.multi_reduction <add>, %88, %cst_24 [0] : vector<4x1xf32> to vector<1xf32>
    %90 = vector.shape_cast %89 : vector<1xf32> to vector<1x1xf32>
    %cst_25 = arith.constant 9.765625E-4 : f32
    %91 = vector.broadcast %cst_25 : f32 to vector<1x1xf32>
    %92 = arith.mulf %90, %91 : vector<1x1xf32>
    %93 = math.sqrt %92 : vector<1x1xf32>
    %cst_26 = arith.constant 9.99999974E-5 : f32
    %94 = vector.broadcast %cst_26 : f32 to vector<1x1xf32>
    %95 = arith.addf %93, %94 : vector<1x1xf32>
    %c20_i32_27 = arith.constant 20 : i32
    %96 = vector.broadcast %c20_i32_27 : i32 to vector<32x1xi32>
    %97 = arith.cmpi sge, %1, %96 : vector<32x1xi32>
    %c24_i32 = arith.constant 24 : i32
    %98 = vector.broadcast %c24_i32 : i32 to vector<32x1xi32>
    %99 = arith.cmpi slt, %1, %98 : vector<32x1xi32>
    %100 = arith.andi %97, %99 : vector<32x1xi1>
    %101 = vector.shape_cast %95 : vector<1x1xf32> to vector<1x1xf32>
    %102 = vector.broadcast %101 : vector<1x1xf32> to vector<32x1xf32>
    %103 = arith.select %100, %102, %87 : vector<32x1xi1>, vector<32x1xf32>
    %104 = vector.extract_strided_slice %6 {offsets = [24, 0], sizes = [4, 1], strides = [1, 1]} : vector<32x1xf32> to vector<4x1xf32>
    %cst_28 = arith.constant dense<0.000000e+00> : vector<1xf32>
    %105 = vector.multi_reduction <add>, %104, %cst_28 [0] : vector<4x1xf32> to vector<1xf32>
    %106 = vector.shape_cast %105 : vector<1xf32> to vector<1x1xf32>
    %cst_29 = arith.constant 9.765625E-4 : f32
    %107 = vector.broadcast %cst_29 : f32 to vector<1x1xf32>
    %108 = arith.mulf %106, %107 : vector<1x1xf32>
    %109 = math.sqrt %108 : vector<1x1xf32>
    %cst_30 = arith.constant 9.99999974E-5 : f32
    %110 = vector.broadcast %cst_30 : f32 to vector<1x1xf32>
    %111 = arith.addf %109, %110 : vector<1x1xf32>
    %c24_i32_31 = arith.constant 24 : i32
    %112 = vector.broadcast %c24_i32_31 : i32 to vector<32x1xi32>
    %113 = arith.cmpi sge, %1, %112 : vector<32x1xi32>
    %c28_i32 = arith.constant 28 : i32
    %114 = vector.broadcast %c28_i32 : i32 to vector<32x1xi32>
    %115 = arith.cmpi slt, %1, %114 : vector<32x1xi32>
    %116 = arith.andi %113, %115 : vector<32x1xi1>
    %117 = vector.shape_cast %111 : vector<1x1xf32> to vector<1x1xf32>
    %118 = vector.broadcast %117 : vector<1x1xf32> to vector<32x1xf32>
    %119 = arith.select %116, %118, %103 : vector<32x1xi1>, vector<32x1xf32>
    %120 = vector.extract_strided_slice %6 {offsets = [28, 0], sizes = [4, 1], strides = [1, 1]} : vector<32x1xf32> to vector<4x1xf32>
    %cst_32 = arith.constant dense<0.000000e+00> : vector<1xf32>
    %121 = vector.multi_reduction <add>, %120, %cst_32 [0] : vector<4x1xf32> to vector<1xf32>
    %122 = vector.shape_cast %121 : vector<1xf32> to vector<1x1xf32>
    %cst_33 = arith.constant 9.765625E-4 : f32
    %123 = vector.broadcast %cst_33 : f32 to vector<1x1xf32>
    %124 = arith.mulf %122, %123 : vector<1x1xf32>
    %125 = math.sqrt %124 : vector<1x1xf32>
    %cst_34 = arith.constant 9.99999974E-5 : f32
    %126 = vector.broadcast %cst_34 : f32 to vector<1x1xf32>
    %127 = arith.addf %125, %126 : vector<1x1xf32>
    %c28_i32_35 = arith.constant 28 : i32
    %128 = vector.broadcast %c28_i32_35 : i32 to vector<32x1xi32>
    %129 = arith.cmpi sge, %1, %128 : vector<32x1xi32>
    %c32_i32 = arith.constant 32 : i32
    %130 = vector.broadcast %c32_i32 : i32 to vector<32x1xi32>
    %131 = arith.cmpi slt, %1, %130 : vector<32x1xi32>
    %132 = arith.andi %129, %131 : vector<32x1xi1>
    %133 = vector.shape_cast %127 : vector<1x1xf32> to vector<1x1xf32>
    %134 = vector.broadcast %133 : vector<1x1xf32> to vector<32x1xf32>
    %135 = arith.select %132, %134, %119 : vector<32x1xi1>, vector<32x1xf32>
    %136 = tpu.reciprocal %135 {approx = true} : vector<32x1xf32> -> vector<32x1xf32>
    %137 = vector.broadcast %136 : vector<32x1xf32> to vector<32x512xf32>
    %138 = arith.mulf %3, %137 : vector<32x512xf32>
    %cst_36 = arith.constant 0.000000e+00 : f32
    %139 = vector.broadcast %cst_36 : f32 to vector<32x512xf32>
    %140 = arith.subf %139, %138 : vector<32x512xf32>
    %141 = math.exp %140 : vector<32x512xf32>
    %cst_37 = arith.constant 1.000000e+00 : f32
    %142 = vector.broadcast %cst_37 : f32 to vector<32x512xf32>
    %143 = arith.addf %142, %141 : vector<32x512xf32>
    %144 = tpu.reciprocal %143 {approx = true} : vector<32x512xf32> -> vector<32x512xf32>
    %145 = arith.mulf %138, %144 : vector<32x512xf32>
    %146 = arith.truncf %145 : vector<32x512xf32> to vector<32x512xbf16>
    %c0_38 = arith.constant 0 : index
    %c0_39 = arith.constant 0 : index
    %147 = vector.load %arg4[%c0_38, %c0_39] : memref<32x512xbf16, #tpu.memory_space<vmem>>, vector<32x512xbf16>
    tpu.vector_store %arg4[%c0_38, %c0_39], %146 {strides = array<i32>} : memref<32x512xbf16, #tpu.memory_space<vmem>>, vector<32x512xbf16>,
    %c0_40 = arith.constant 0 : index
    %c0_41 = arith.constant 0 : index
    %148 = vector.load %arg4[%c0_40, %c0_41] : memref<32x512xbf16, #tpu.memory_space<vmem>>, vector<32x384xbf16>
    %c0_42 = arith.constant 0 : index
    %c0_43 = arith.constant 0 : index
    %149 = vector.load %arg5[%c0_42, %c0_43] : memref<288x384xbf16, #tpu.memory_space<vmem>>, vector<32x384xbf16>
    tpu.vector_store %arg5[%c0_42, %c0_43], %148 {strides = array<i32>} : memref<288x384xbf16, #tpu.memory_space<vmem>>, vector<32x384xbf16>,
    %c0_44 = arith.constant 0 : index
    %c1 = arith.constant 1 : index
    %150 = vector.load %arg4[%c0_44, %c1] : memref<32x512xbf16, #tpu.memory_space<vmem>>, vector<32x384xbf16>
    %c32 = arith.constant 32 : index
    %c0_45 = arith.constant 0 : index
    %151 = vector.load %arg5[%c32, %c0_45] : memref<288x384xbf16, #tpu.memory_space<vmem>>, vector<32x384xbf16>
    tpu.vector_store %arg5[%c32, %c0_45], %150 {strides = array<i32>} : memref<288x384xbf16, #tpu.memory_space<vmem>>, vector<32x384xbf16>,
    %c0_46 = arith.constant 0 : index
    %c2 = arith.constant 2 : index
    %152 = vector.load %arg4[%c0_46, %c2] : memref<32x512xbf16, #tpu.memory_space<vmem>>, vector<32x384xbf16>
    %c64 = arith.constant 64 : index
    %c0_47 = arith.constant 0 : index
    %153 = vector.load %arg5[%c64, %c0_47] : memref<288x384xbf16, #tpu.memory_space<vmem>>, vector<32x384xbf16>
    tpu.vector_store %arg5[%c64, %c0_47], %152 {strides = array<i32>} : memref<288x384xbf16, #tpu.memory_space<vmem>>, vector<32x384xbf16>,
    %c0_48 = arith.constant 0 : index
    %c18 = arith.constant 18 : index
    %154 = vector.load %arg4[%c0_48, %c18] : memref<32x512xbf16, #tpu.memory_space<vmem>>, vector<32x384xbf16>
    %c96 = arith.constant 96 : index
    %c0_49 = arith.constant 0 : index
    %155 = vector.load %arg5[%c96, %c0_49] : memref<288x384xbf16, #tpu.memory_space<vmem>>, vector<32x384xbf16>
    tpu.vector_store %arg5[%c96, %c0_49], %154 {strides = array<i32>} : memref<288x384xbf16, #tpu.memory_space<vmem>>, vector<32x384xbf16>,
    %c0_50 = arith.constant 0 : index
    %c19 = arith.constant 19 : index
    %156 = vector.load %arg4[%c0_50, %c19] : memref<32x512xbf16, #tpu.memory_space<vmem>>, vector<32x384xbf16>
    %c128 = arith.constant 128 : index
    %c0_51 = arith.constant 0 : index
    %157 = vector.load %arg5[%c128, %c0_51] : memref<288x384xbf16, #tpu.memory_space<vmem>>, vector<32x384xbf16>
    tpu.vector_store %arg5[%c128, %c0_51], %156 {strides = array<i32>} : memref<288x384xbf16, #tpu.memory_space<vmem>>, vector<32x384xbf16>,
    %c0_52 = arith.constant 0 : index
    %c20 = arith.constant 20 : index
    %158 = vector.load %arg4[%c0_52, %c20] : memref<32x512xbf16, #tpu.memory_space<vmem>>, vector<32x384xbf16>
    %c160 = arith.constant 160 : index
    %c0_53 = arith.constant 0 : index
    %159 = vector.load %arg5[%c160, %c0_53] : memref<288x384xbf16, #tpu.memory_space<vmem>>, vector<32x384xbf16>
    tpu.vector_store %arg5[%c160, %c0_53], %158 {strides = array<i32>} : memref<288x384xbf16, #tpu.memory_space<vmem>>, vector<32x384xbf16>,
    %c0_54 = arith.constant 0 : index
    %c36 = arith.constant 36 : index
    %160 = vector.load %arg4[%c0_54, %c36] : memref<32x512xbf16, #tpu.memory_space<vmem>>, vector<32x384xbf16>
    %c192 = arith.constant 192 : index
    %c0_55 = arith.constant 0 : index
    %161 = vector.load %arg5[%c192, %c0_55] : memref<288x384xbf16, #tpu.memory_space<vmem>>, vector<32x384xbf16>
    tpu.vector_store %arg5[%c192, %c0_55], %160 {strides = array<i32>} : memref<288x384xbf16, #tpu.memory_space<vmem>>, vector<32x384xbf16>,
    %c0_56 = arith.constant 0 : index
    %c37 = arith.constant 37 : index
    %162 = vector.load %arg4[%c0_56, %c37] : memref<32x512xbf16, #tpu.memory_space<vmem>>, vector<32x384xbf16>
    %c224 = arith.constant 224 : index
    %c0_57 = arith.constant 0 : index
    %163 = vector.load %arg5[%c224, %c0_57] : memref<288x384xbf16, #tpu.memory_space<vmem>>, vector<32x384xbf16>
    tpu.vector_store %arg5[%c224, %c0_57], %162 {strides = array<i32>} : memref<288x384xbf16, #tpu.memory_space<vmem>>, vector<32x384xbf16>,
    %c0_58 = arith.constant 0 : index
    %c38 = arith.constant 38 : index
    %164 = vector.load %arg4[%c0_58, %c38] : memref<32x512xbf16, #tpu.memory_space<vmem>>, vector<32x384xbf16>
    %c256 = arith.constant 256 : index
    %c0_59 = arith.constant 0 : index
    %165 = vector.load %arg5[%c256, %c0_59] : memref<288x384xbf16, #tpu.memory_space<vmem>>, vector<32x384xbf16>
    tpu.vector_store %arg5[%c256, %c0_59], %164 {strides = array<i32>} : memref<288x384xbf16, #tpu.memory_space<vmem>>, vector<32x384xbf16>,
    %c0_60 = arith.constant 0 : index
    %c0_61 = arith.constant 0 : index
    %166 = vector.load %arg5[%c0_60, %c0_61] : memref<288x384xbf16, #tpu.memory_space<vmem>>, vector<288x384xbf16>
    %cst_62 = arith.constant dense<0.000000e+00> : vector<16x384xf32>
    %167 = tpu.matmul %0, %166, %cst_62 {dimension_numbers = #tpu.dot_dimension_numbers<[1], [0], [0], [1], [0, 0, 1, 1], [], []>} : vector<16x288xbf16>, vector<288x384xbf16>, vector<16x384xf32> -> vector<16x384xf32>
    %c0_63 = arith.constant 0 : index
    %c0_64 = arith.constant 0 : index
    %c0_65 = arith.constant 0 : index
    %168 = vector.load %arg3[%c0_63, %c0_64, %c0_65] : memref<1x16x384xf32, #tpu.memory_space<vmem>>, vector<1x16x384xf32>
    %169 = vector.shape_cast %168 : vector<1x16x384xf32> to vector<16x384xf32>
    %170 = vector.shape_cast %167 : vector<16x384xf32> to vector<1x16x384xf32>
    tpu.vector_store %arg3[%c0_63, %c0_64, %c0_65], %170 {strides = array<i32>} : memref<1x16x384xf32, #tpu.memory_space<vmem>>, vector<1x16x384xf32>,
    return
  }
  func.func @transform_0(%arg0: i32) -> (i32, i32, i32) {
    %c0_i32 = arith.constant 0 : i32
    %c0_i32_0 = arith.constant 0 : i32
    %c0_i32_1 = arith.constant 0 : i32
    return %arg0, %c0_i32, %c0_i32_0 : i32, i32, i32
  }
  func.func @transform_1(%arg0: i32) -> (i32, i32) {
    %c0_i32 = arith.constant 0 : i32
    %c0_i32_0 = arith.constant 0 : i32
    %c0_i32_1 = arith.constant 0 : i32
    return %c0_i32, %c0_i32_0 : i32, i32
  }
  func.func @transform_2(%arg0: i32) -> (i32, i32, i32) {
    %c0_i32 = arith.constant 0 : i32
    %c0_i32_0 = arith.constant 0 : i32
    %c0_i32_1 = arith.constant 0 : i32
    return %arg0, %c0_i32, %c0_i32_0 : i32, i32, i32
  }
}

</mosaic_0001>

<bundles_post_ra>
// kernel: tpu_custom_call.1
= control target key start
LH: loop header
LB: loop body
LE: loop exit
PB: predicated region body
PF: predicated region fallthrough
CT: control target
= control target key end

     0   :  { %7 = vsyncpa [#allocation5], 0  ;;  %s3192_s0 = inlined_call_operand.hbm [shape: f32[2,32,512], index: 0, kind: input, shape index: {}]   ;;  %s3193_s1 = inlined_call_operand.hbm [shape: bf16[16,288], index: 1, kind: input, shape index: {}]   ;;  %s3194_s2 = inlined_call_operand.hbm [shape: f32[2,16,384], index: 2, kind: output, shape index: {}]  }
   0x1   :  { %9 = vsyncpa [#allocation5 + $0x1], 0 }
   0x2   :  { %10 = vsyncpa [#allocation8], 0 }
   0x3   :  { %11 = vsyncpa [#allocation6], 0 }
   0x4   :  { %13 = vsyncpa [#allocation6 + $0x1], 0  ;;  %s2488_s9 = smov 0   ;;  %s2490_s10 = smov 0  }
   0x5   :  { %s2492_s11 = smov 0   ;;  %s2494_s12 = smov 0  }
   0x6 LB: > { %s2509_s13 = sadd.s32 4294967295, %s2456_s12   ;;  %s1863_s14 = sadd.s32 4294967294, %s2456_s12   ;;  %s2456_s12 = sphi %s2494_s12, %s3204_s12   ;;  %s2452_s11 = sphi %s2492_s11, %s3203_s11   ;;  %s2448_s10 = sphi %s2490_s10, %s3202_s10   ;;  %s2444_s9 = sphi %s2488_s9, %s3201_s9  }
   0x7   : > { %p39_p0 = scmp.ne.s32.totalorder %s2448_s10, %s2444_s9  ;;  %p40_p1 = scmp.eq.s32.totalorder %s2509_s13, 0 }
   0x8   : > { %p84_p2 = scmp.eq.s32.totalorder %s2509_s13, 1  ;;  %p90_p3 = scmp.eq.s32.totalorder %s1863_s14, 1 }
   0x9   : > { %p2518_p4 = por %p40_p1, %p39_p0  ;;  %p1864_p5 = scmp.ge.s32.totalorder %s2456_s12, 1 }
   0xa   : > { %p2523_p6 = por %p90_p3, %p39_p0  ;;  %p97_p7 = scmp.lt.s32.totalorder %s2456_s12, 3 }
   0xb   : > { %s108_s19 = sshll.u32 %s3193_s1, 4  ;;  %s2458_s21 = smov [#allocation7]   ;;  %s109_s19 = int_to_ptr.hbm [resolvable:$true] %s108_s19 }
   0xc   : > { %p2531_p8 = pnand %p1864_p5, %p97_p7  ;;  %s110_s22 = sshll.u32 %s2458_s21, 4  ;;  %s111_s22 = int_to_ptr.vmem [resolvable:$true] %s110_s22 }
   0xd   : > { %s2541_s23 = sadd.s32 1, %s2456_s12   ;;  %s2459_s24 = smov 192  }
   0xe   : > { %p2175_p9 = pneg %p2531_p8  ;;  %s2460_s25 = smov 12  }
   0xf   : > { %s23_s26 = ssub.s32 %s2456_s12, %s2541_s23  ;;  %s26_s27 = sadd.s32 1, %s2452_s11 }
  0x10   : > { %p2176_p10 = pnand %p2175_p9, %p40_p1  ;;  %p24_p12 = scmp.eq.s32.totalorder %s23_s26, 0 }
  0x11   : > { %p33_p13 = scmp.ne.s32.totalorder %s2452_s11, %s2448_s10  ;;  %p34_p0 = scmp.eq.s32.totalorder %s2456_s12, 0 }
  0x12   : > { %2178 = dma.hbm_to_vmem [thread:$0]  (!%p2176_p10), %s109_s19, 384, %s111_s22, [#allocation8], %s2459_s24, %s2459_s24, %s2460_s25  }
  0x13   : > { %p2188_p3 = scmp.lt.s32.totalorder %s2456_s12, 2  ;;  %p35_p5 = por %p34_p0, %p33_p13 }
  0x14   : > { %s2551_s28 = scalar_select %p24_p12, %s2452_s11, %s26_s27  }
  0x15   : > { %p2555_p7 = por %p84_p2, %p33_p13  ;;  %s124_s30 = sand.u32 1, %s2452_s11  }
  0x16   : > { %s2107_s3 = sshll.u32 %s2456_s12, 7  ;;  %s1867_s4 = sshll.u32 %s124_s30, 7 }
  0x17   : > { %s133_s7 = scalar_lea.hbm %s3192_s0, %s2107_s3  ;;  %s128_s14 = scalar_lea.vmem [#allocation4], %s1867_s4 }
  0x18   : > { %s134_s8 = sshll.u32 %s133_s7, 4  ;;  %s136_s17 = sshll.u32 %s128_s14, 4  ;;  %s135_s8 = int_to_ptr.hbm [resolvable:$true] %s134_s8  ;;  %s137_s17 = int_to_ptr.vmem [resolvable:$true] %s136_s17 }
  0x19   : > { %p2566_p9 = pnand %p2188_p3, %p35_p5  ;;  %s125_s19 = scalar_lea.sflag [#allocation5], %s124_s30 }
  0x1a   : > { %s2356_s21 = sshra.s32 %s135_s8, 4  ;;  %s2363_s26 = scalar_lea.hbm %s3192_s0, 256  ;;  %s2357_s21 = int_to_ptr.hbm [resolvable:$true] %s2356_s21 }
  0x1b   : > { %s2358_s22 = scalar_lea.hbm %s2357_s21, 128  ;;  %p2360_p10 = pneg %p2566_p9 }
  0x1c   : > { %p2359_p2 = scmp.ne.s32.totalorder %s2357_s21, %s2358_s22  ;;  %p2364_p0 = scmp.lt.s32.totalorder %s2357_s21, %s3192_s0 }
  0x1d   : > { %p2365_p3 = scmp.lt.s32.totalorder %s2363_s26, %s2358_s22 }
  0x1e   : > { %p2361_p12 = pnand %p2360_p10, %p2359_p2 }
  0x1f   : > { %p2366_p5 = por %p2365_p3, %p2364_p0 }
  0x20   : > { %p2362_p13 = pneg %p2361_p12 }
  0x22   : > { %p2367_p11 = pnand %p2366_p5, %p2362_p13 }
  0x24   : > { %2370 = shalt.err (!%p2367_p11)
}
  0x25   : > { %s2461_s30 = smov 512   ;;  %s2462_s4 = smov 32  }
  0x26   : > { %2182 = dma.hbm_to_vmem [thread:$0]  (!%p2566_p9), %s135_s8, 2048, %s137_s17, %s125_s19, %s2461_s30, %s2461_s30, %s2462_s4  }
  0x27   : > { %148 = sbr.rel (%p2531_p8) target bundleno = 724 (0x2d4), region = 28  ;;  %s2583_s5 = sand.u32 (!%p2531_p8), 1, %s2448_s10  }
  0x28   : > { %s1871_s6 = sshll.u32 (!%p2531_p8), %s2583_s5, 7  ;;  %s151_s7 = scalar_lea.sflag (!%p2531_p8), [#allocation5], %s2583_s5 }
  0x29   : > { %s2587_s14 = scalar_lea.vmem (!%p2531_p8), [#allocation4], %s1871_s6 }
  0x2c   : > { %2431 = dma.done.wait (%p2518_p4), %s151_s7, 2048  }
  0x2d   : > { %2433 = vsyncadd (%p2518_p4), %s151_s7, 4294965248 }
  0x2e   : > { %2435 = dma.done.wait (%p40_p1), [#allocation8], 384  }
  0x2f   : > { %2437 = vsyncadd (%p40_p1), [#allocation8], 4294966912  ;;  %v2598_v0 = vld [vmem:[%s2587_s14 + $0x40] sm:$0xff]  ;;  %v2601_v1 = vld [vmem:[%s2587_s14 + $0x48] sm:$0xff]  ;;  %vm243_vm0 = vcmask 1043456   ;;  %s2463_s15 = smov 110  }
  0x30   : > { %v2604_v2 = vld [vmem:[%s2587_s14 + $0x50] sm:$0xff]  ;;  %v2607_v3 = vld [vmem:[%s2587_s14 + $0x58] sm:$0xff]  ;;  %v215_v4 = vmul.f32 %v2598_v0, %v2598_v0  ;;  %v216_v5 = vmul.f32 %v2601_v1, %v2601_v1  ;;  %v2616_v7 = vld [vmem:[%s2587_s14] sm:$0xff]  ;;  %s2464_s20 = smov 91   ;;  %s2465_s8 = smov 126  }
  0x31   : > { %v217_v6 = vmul.f32 %v2604_v2, %v2604_v2  ;;  %v2619_v8 = vld [vmem:[%s2587_s14 + $0x8] sm:$0xff]  ;;  %v2622_v9 = vld [vmem:[%s2587_s14 + $0x10] sm:$0xff]  ;;  %v2625_v10 = vld [vmem:[%s2587_s14 + $0x18] sm:$0xff]  ;;  %v207_v11 = vmul.f32 %v2616_v7, %v2616_v7  ;;  %v218_v14 = vmul.f32 %v2607_v3, %v2607_v3  ;;  %s2466_s17 = smov 92   ;;  %s2467_s18 = smov 90  }
  0x32   : > { %v208_v12 = vmul.f32 %v2619_v8, %v2619_v8  ;;  %v2632_v13 = vld [vmem:[%s2587_s14 + $0x60] sm:$0xff]  ;;  %v233_v15 = vadd.f32 %v216_v5, %v215_v4  ;;  %v209_v16 = vmul.f32 %v2622_v9, %v2622_v9  ;;  %v2639_v17 = vld [vmem:[%s2587_s14 + $0x68] sm:$0xff]  ;;  %v2642_v18 = vld [vmem:[%s2587_s14 + $0x70] sm:$0xff]  ;;  %v210_v20 = vmul.f32 %v2625_v10, %v2625_v10  ;;  %s2468_s19 = smov 127   ;;  %s2469_s21 = smov 108  }
  0x33   : > { %v219_v19 = vmul.f32 %v2632_v13, %v2632_v13  ;;  %v220_v22 = vmul.f32 %v2639_v17, %v2639_v17  ;;  %v2651_v23 = vld [vmem:[%s2587_s14 + $0x20] sm:$0xff]  ;;  %v2654_v24 = vld [vmem:[%s2587_s14 + $0x28] sm:$0xff]  ;;  %v2657_v25 = vld [vmem:[%s2587_s14 + $0x30] sm:$0xff]  ;;  %v221_v27 = vmul.f32 %v2642_v18, %v2642_v18  ;;  %s2470_s22 = smov 109   ;;  %s2165_s24 = smul.u32 48, %s2583_s5 }
  0x34   : > { %v223_v21 = vadd.f32 %v208_v12, %v207_v11  ;;  %v234_v26 = vadd.f32 %v233_v15, %v217_v6  ;;  %v211_v28 = vmul.f32 %v2651_v23, %v2651_v23  ;;  %v212_v29 = vmul.f32 %v2654_v24, %v2654_v24  ;;  %v2666_v31 = vld [vmem:[%s2587_s14 + $0x78] sm:$0xff]  ;;  %s2166_s26 = smul.u32 48, %s2509_s13  ;;  %s1765_s7 = scalar_lea.sflag [#allocation6], %s2583_s5 }
  0x35   : > { %v238_v32 = vadd.f32 %v220_v22, %v219_v19  ;;  %v213_v33 = vmul.f32 %v2657_v25, %v2657_v25  ;;  %v2671_v35 = vld [vmem:[%s2587_s14 + $0x38] sm:$0xff]  ;;  %v222_v38 = vmul.f32 %v2666_v31, %v2666_v31  ;;  %s3150_s25 = scalar_lea.vmem [#allocation9], %s2165_s24 }
  0x36   : > { %v224_v30 = vadd.f32 %v223_v21, %v209_v16  ;;  %v235_v34 = vadd.f32 %v234_v26, %v218_v14  ;;  %v228_v36 = vadd.f32 %v212_v29, %v211_v28  ;;  %v214_v40 = vmul.f32 %v2671_v35, %v2671_v35  ;;  %s1776_s30 = scalar_lea.hbm %s3194_s2, %s2166_s26  ;;  %s1777_s4 = sshll.u32 %s3150_s25, 4  ;;  %s1778_s4 = int_to_ptr.vmem [resolvable:$true] %s1777_s4 }
  0x37   : > { %v239_v39 = vadd.f32 %v238_v32, %v221_v27  ;;  %s1779_s6 = sshll.u32 %s1776_s30, 4  ;;  %s1780_s6 = int_to_ptr.hbm [resolvable:$true] %s1779_s6 }
  0x38   : > { %v225_v37 = vadd.f32 %v224_v30, %v210_v20  ;;  %236 = vadd.xlane.f32.xlu0 %v235_v34  ;;  %v229_v41 = vadd.f32 %v228_v36, %v213_v33  ;;  %s2400_s14 = sshra.s32 %s1780_s6, 4  ;;  %s2401_s14 = int_to_ptr.hbm [resolvable:$true] %s2400_s14 }
  0x39   : > { %v240_v42 = vadd.f32 %v239_v39, %v222_v38  ;;  %s2402_s13 = scalar_lea.hbm %s2401_s14, 48  ;;  %p2407_p11 = scmp.lt.s32.totalorder %s2401_s14, %s3194_s2 }
  0x3a   : > { %226 = vadd.xlane.f32.xlu1 %v225_v37  ;;  %v230_v43 = vadd.f32 %v229_v41, %v214_v40  ;;  %v186_v40 = vlaneseq  ;;  %p2403_p1 = scmp.ne.s32.totalorder %s2401_s14, %s2402_s13 }
  0x3c   : > { %p2404_p4 = pnand %p2403_p1, %p2555_p7 }
  0x3e   : > { %p2405_p8 = pneg %p2404_p4 }
  0x40   : > { %241 = vadd.xlane.f32.xlu0 %v240_v42 }
  0x42   : > { %231 = vadd.xlane.f32.xlu1 %v230_v43 }
  0xab   : > { %v237_v44 = vpop.xlane.xlu0 %236 }
  0xac   : > { %v398_v45 = vsel %vm243_vm0, %v237_v44, 0.0  ;;  %v436_v46 = vrot.slane %v237_v44, 4 }
  0xad   : > { %v227_v47 = vpop.xlane.xlu1 %226  ;;  %v399_v48 = vrot.slane %v398_v45, 4 }
  0xae   : > { %v244_v49 = vsel %vm243_vm0, %v227_v47, 0.0  ;;  %v282_v50 = vrot.slane %v227_v47, 4  ;;  %v438_v51 = vsel %vm243_vm0, %v436_v46, 0.0  ;;  %v2695_v47 = vshrl.u32 %v186_v40, 7 }
  0xaf   : > { %v245_v52 = vrot.slane %v244_v49, 4  ;;  %v400_v53 = vadd.f32 %v399_v48, %v398_v45  ;;  %v439_v54 = vrot.slane %v438_v51, 4 }
  0xb0   : > { %v284_v55 = vsel %vm243_vm0, %v282_v50, 0.0  ;;  %vm269_vm6 = vcmp.lt.s32.totalorder %v2695_v47, 4  ;;  %vm305_vm10 = vcmp.ge.s32.totalorder %v2695_v47, 4 }
  0xb1   : > { %v246_v56 = vadd.f32 %v245_v52, %v244_v49  ;;  %v285_v57 = vrot.slane %v284_v55, 4  ;;  %v401_v58 = vrot.slane %v400_v53, 2  ;;  %v440_v59 = vadd.f32 %v439_v54, %v438_v51 }
  0xb3   : > { %v247_v60 = vrot.slane %v246_v56, 2  ;;  %v286_v61 = vadd.f32 %v285_v57, %v284_v55  ;;  %v402_v62 = vadd.f32 %v401_v58, %v400_v53  ;;  %v441_v63 = vrot.slane %v440_v59, 2  ;;  %v242_v4 = vpop.xlane.xlu0 %241 }
  0xb4   : > { %v475_v11 = vsel %vm243_vm0, %v242_v4, 0.0  ;;  %v513_v16 = vrot.slane %v242_v4, 4  ;;  %v2701_v57 = vadd.s32 16, %v2695_v47 }
  0xb5   : > { %v248_v5 = vadd.f32 %v247_v60, %v246_v56  ;;  %v287_v6 = vrot.slane %v286_v61, 2  ;;  %v403_v12 = vrot.slane %v402_v62, 1  ;;  %v442_v14 = vadd.f32 %v441_v63, %v440_v59  ;;  %v232_v21 = vpop.xlane.xlu1 %231 }
  0xb6   : > { %v476_v15 = vrot.slane %v475_v11, 4  ;;  %v515_v30 = vsel %vm243_vm0, %v513_v16, 0.0  ;;  %v321_v34 = vsel %vm243_vm0, %v232_v21, 0.0  ;;  %v359_v46 = vrot.slane %v232_v21, 4 }
  0xb7   : > { %v249_v19 = vrot.slane %v248_v5, 1  ;;  %v288_v20 = vadd.f32 %v287_v6, %v286_v61  ;;  %v404_v22 = vadd.f32 %v403_v12, %v402_v62  ;;  %v443_v26 = vrot.slane %v442_v14, 1 }
  0xb8   : > { %v477_v27 = vadd.f32 %v476_v15, %v475_v11  ;;  %v516_v39 = vrot.slane %v515_v30, 4  ;;  %v322_v42 = vrot.slane %v321_v34, 4  ;;  %v361_v52 = vsel %vm243_vm0, %v359_v46, 0.0 }
  0xb9   : > { %v250_v28 = vadd.f32 %v249_v19, %v248_v5  ;;  %v289_v29 = vrot.slane %v288_v20, 1  ;;  %v2683_v32 = vmul.f32 0.0009765625, %v404_v22  ;;  %v444_v33 = vadd.f32 %v443_v26, %v442_v14 }
  0xba   : > { %v478_v38 = vrot.slane %v477_v27, 2  ;;  %v517_v45 = vadd.f32 %v516_v39, %v515_v30  ;;  %v323_v50 = vadd.f32 %v322_v42, %v321_v34  ;;  %v362_v60 = vrot.slane %v361_v52, 4 }
  0xbb   : > { %v2686_v36 = vmul.f32 0.0009765625, %v250_v28  ;;  %v290_v37 = vadd.f32 %v289_v29, %v288_v20  ;;  %2238 = vrsqrt.f32 %v2683_v32  ;;  %v2689_v41 = vmul.f32 0.0009765625, %v444_v33 }
  0xbc   : > { %v479_v44 = vadd.f32 %v478_v38, %v477_v27  ;;  %v518_v49 = vrot.slane %v517_v45, 2  ;;  %v324_v59 = vrot.slane %v323_v50, 2  ;;  %v2705_v63 = vadd.s32 24, %v2695_v47 }
  0xbd   : > { %2240 = vrsqrt.f32 %v2686_v36  ;;  %v2692_v43 = vmul.f32 0.0009765625, %v290_v37  ;;  %vm413_vm1 = vcmp.eq.f32.partialorder %v2683_v32, inf  ;;  %v363_v15 = vadd.f32 %v362_v60, %v361_v52 }
  0xbe   : > { %2242 = vrsqrt.f32 %v2689_v41  ;;  %v480_v48 = vrot.slane %v479_v44, 1  ;;  %v519_v56 = vadd.f32 %v518_v49, %v517_v45  ;;  %v325_v14 = vadd.f32 %v324_v59, %v323_v50 }
  0xbf   : > { %2244 = vrsqrt.f32 %v2692_v43  ;;  %vm415_vm2 = vcmp.eq.f32.partialorder %v2683_v32, 0.0  ;;  %v416_v19 = vand.u32 2147483648, %v2683_v32  ;;  %vm425_vm3 = vcmp.lt.s32.totalorder %v2701_v57, 20 }
  0xc0   : > { %v481_v55 = vadd.f32 %v480_v48, %v479_v44  ;;  %v520_v5 = vrot.slane %v519_v56, 1  ;;  %vm259_vm4 = vcmp.eq.f32.partialorder %v2686_v36, inf  ;;  %vm261_vm5 = vcmp.eq.f32.partialorder %v2686_v36, 0.0 }
  0xc1   : > { %v2239_v51 = vpop.eup %2238  ;;  %v326_v29 = vrot.slane %v325_v14, 1  ;;  %v262_v34 = vand.u32 2147483648, %v2686_v36  ;;  %v364_v37 = vrot.slane %v363_v15, 2  ;;  %vm461_vm7 = vcmp.ge.s32.totalorder %v2701_v57, 20 }
  0xc2   : > { %v407_v54 = vmul.f32 %v2239_v51, %v2683_v32  ;;  %v2707_v4 = vmul.f32 0.0009765625, %v481_v55  ;;  %v521_v28 = vadd.f32 %v520_v5, %v519_v56  ;;  %vm453_vm8 = vcmp.eq.f32.partialorder %v2689_v41, inf }
  0xc3   : > { %v2241_v53 = vpop.eup %2240  ;;  %v327_v42 = vadd.f32 %v326_v29, %v325_v14  ;;  %vm455_vm9 = vcmp.eq.f32.partialorder %v2689_v41, 0.0  ;;  %v456_v49 = vand.u32 2147483648, %v2689_v41  ;;  %vm299_vm11 = vcmp.eq.f32.partialorder %v2692_v43, inf }
  0xc4   : > { %v253_v58 = vmul.f32 %v2241_v53, %v2686_v36  ;;  %v2243_v61 = vpop.eup %2242  ;;  %v408_v62 = vmul.f32 %v2239_v51, %v407_v54  ;;  %2246 = vrsqrt.f32 %v2707_v4  ;;  %v2721_v40 = vmul.f32 0.0009765625, %v521_v28 }
  0xc5   : > { %v2245_v6 = vpop.eup %2244  ;;  %v447_v11 = vmul.f32 %v2243_v61, %v2689_v41  ;;  %v2735_v56 = vmul.f32 0.0009765625, %v327_v42  ;;  %v302_v14 = vand.u32 2147483648, %v2692_v43  ;;  %vm301_vm12 = vcmp.eq.f32.partialorder %v2692_v43, 0.0 }
  0xc6   : > { %v254_v12 = vmul.f32 %v2241_v53, %v253_v58  ;;  %v409_v16 = vmul.f32 0.5, %v408_v62  ;;  %v293_v20 = vmul.f32 %v2245_v6, %v2692_v43  ;;  %2248 = vrsqrt.f32 %v2721_v40 }
  0xc7   : > { %v448_v21 = vmul.f32 %v2243_v61, %v447_v11  ;;  %v365_v58 = vadd.f32 %v364_v37, %v363_v15  ;;  %2250 = vrsqrt.f32 %v2735_v56  ;;  %vm503_vm13 = vcmp.lt.s32.totalorder %v2705_v63, 28 }
  0xc8   : > { %v255_v22 = vmul.f32 0.5, %v254_v12  ;;  %v410_v26 = vsub.f32 1.5, %v409_v16  ;;  %v294_v27 = vmul.f32 %v2245_v6, %v293_v20  ;;  %vm490_vm14 = vcmp.eq.f32.partialorder %v2707_v4, inf }
  0xc9   : > { %v449_v30 = vmul.f32 0.5, %v448_v21  ;;  %v493_v57 = vand.u32 2147483648, %v2707_v4  ;;  %vm539_vm15 = vcmp.ge.s32.totalorder %v2705_v63, 28 }
  0xca   : > { %v256_v33 = vsub.f32 1.5, %v255_v22  ;;  %v411_v38 = vmul.f32 %v2239_v51, %v410_v26  ;;  %v295_v39 = vmul.f32 0.5, %v294_v27  ;;  %v2247_v46 = vpop.eup %2246 }
  0xcb   : > { %v450_v44 = vsub.f32 1.5, %v449_v30  ;;  %v484_v54 = vmul.f32 %v2247_v46, %v2707_v4  ;;  %v366_v30 = vrot.slane %v365_v58, 1 }
  0xcc   : > { %v257_v45 = vmul.f32 %v2241_v53, %v256_v33  ;;  %v412_v48 = vmul.f32 %v411_v38, %v2683_v32  ;;  %v296_v50 = vsub.f32 1.5, %v295_v39  ;;  %v2249_v16 = vpop.eup %2248 }
  0xcd   : > { %v451_v51 = vmul.f32 %v2243_v61, %v450_v44  ;;  %v485_v62 = vmul.f32 %v2247_v46, %v484_v54  ;;  %v524_v29 = vmul.f32 %v2249_v16, %v2721_v40  ;;  %v367_v38 = vadd.f32 %v366_v30, %v365_v58 }
  0xce   : > { %v258_v52 = vmul.f32 %v257_v45, %v2686_v36  ;;  %v414_v55 = vsel %vm413_vm1, %v2683_v32, %v412_v48  ;;  %v297_v53 = vmul.f32 %v2245_v6, %v296_v50  ;;  %vm492_vm1 = vcmp.eq.f32.partialorder %v2707_v4, 0.0 }
  0xcf   : > { %v417_v59 = vsel %vm415_vm2, %v416_v19, %v414_v55  ;;  %v452_v60 = vmul.f32 %v451_v51, %v2689_v41  ;;  %v486_v15 = vmul.f32 0.5, %v485_v62  ;;  %v2771_v45 = vmul.f32 0.0009765625, %v367_v38 }
  0xd0   : > { %v260_v61 = vsel %vm259_vm4, %v2686_v36, %v258_v52  ;;  %v418_v5 = vadd.f32 0.0001, %v417_v59  ;;  %v298_v12 = vmul.f32 %v297_v53, %v2692_v43  ;;  %v2777_v48 = vadd.s32 8, %v2695_v47 }
  0xd1   : > { %v263_v11 = vsel %vm261_vm5, %v262_v34, %v260_v61  ;;  %v454_v32 = vsel %vm453_vm8, %v2689_v41, %v452_v60  ;;  %v487_v27 = vsub.f32 1.5, %v486_v15  ;;  %v2251_v34 = vpop.eup %2250  ;;  %vm530_vm2 = vcmp.eq.f32.partialorder %v2721_v40, inf }
  0xd2   : > { %v264_v6 = vadd.f32 0.0001, %v263_v11  ;;  %v433_v19 = vsel %vm425_vm3, %v418_v5, 0.0  ;;  %v457_v36 = vsel %vm455_vm9, %v456_v49, %v454_v32  ;;  %v300_v20 = vsel %vm299_vm11, %v2692_v43, %v298_v12 }
  0xd3   : > { %v458_v21 = vadd.f32 0.0001, %v457_v36  ;;  %v303_v26 = vsel %vm301_vm12, %v302_v14, %v300_v20  ;;  %v488_v33 = vmul.f32 %v2247_v46, %v487_v27  ;;  %v525_v43 = vmul.f32 %v2249_v16, %v524_v29 }
  0xd4   : > { %v277_v22 = vsel %vm269_vm6, %v264_v6, 0.0  ;;  %v304_v28 = vadd.f32 0.0001, %v303_v26  ;;  %v330_v42 = vmul.f32 %v2251_v34, %v2735_v56  ;;  %vm532_vm3 = vcmp.eq.f32.partialorder %v2721_v40, 0.0 }
  0xd5   : > { %v473_v41 = vsel %vm461_vm7, %v458_v21, %v433_v19  ;;  %v489_v39 = vmul.f32 %v488_v33, %v2707_v4  ;;  %v526_v44 = vmul.f32 0.5, %v525_v43  ;;  %v533_v54 = vand.u32 2147483648, %v2721_v40 }
  0xd6   : > { %2252 = vrcp.f32 %v473_v41  ;;  %v317_v37 = vsel %vm305_vm10, %v304_v28, %v277_v22  ;;  %v331_v49 = vmul.f32 %v2251_v34, %v330_v42  ;;  %vm336_vm4 = vcmp.eq.f32.partialorder %v2735_v56, inf }
  0xd7   : > { %2254 = vrcp.f32 %v317_v37  ;;  %v491_v46 = vsel %vm490_vm14, %v2707_v4, %v489_v39  ;;  %v527_v51 = vsub.f32 1.5, %v526_v44  ;;  %vm338_vm5 = vcmp.eq.f32.partialorder %v2735_v56, 0.0 }
  0xd8   : > { %v494_v50 = vsel %vm492_vm1, %v493_v57, %v491_v46  ;;  %2256 = vrsqrt.f32 %v2771_v45  ;;  %v332_v55 = vmul.f32 0.5, %v331_v49  ;;  %v339_v47 = vand.u32 2147483648, %v2735_v56 }
  0xd9   : > { %v495_v52 = vadd.f32 0.0001, %v494_v50  ;;  %v528_v58 = vmul.f32 %v2249_v16, %v527_v51  ;;  %vm347_vm6 = vcmp.lt.s32.totalorder %v2777_v48, 12  ;;  %vm383_vm7 = vcmp.ge.s32.totalorder %v2777_v48, 12 }
  0xda   : > { %v333_v60 = vsub.f32 1.5, %v332_v55  ;;  %vm376_vm8 = vcmp.eq.f32.partialorder %v2771_v45, inf  ;;  %vm378_vm9 = vcmp.eq.f32.partialorder %v2771_v45, 0.0  ;;  %v379_v44 = vand.u32 2147483648, %v2771_v45 }
  0xdb   : > { %v511_v59 = vsel %vm503_vm13, %v495_v52, 0.0  ;;  %v529_v5 = vmul.f32 %v528_v58, %v2721_v40  ;;  %vm880_vm10 = vcmask 900096   ;;  %vm1156_vm11 = vcmask 744448  }
  0xdc   : > { %v2253_v53 = vpop.eup %2252  ;;  %v334_v6 = vmul.f32 %v2251_v34, %v333_v60  ;;  %vm811_vm12 = vcmask 1031168   ;;  %vm1087_vm13 = vcmask 752640   ;;  %vm1225_vm14 = vcmask 736256  }
  0xdd   : > { %v2255_v4 = vpop.eup %2254  ;;  %v2789_v61 = vmul.f32 %v2253_v53, %v2598_v0  ;;  %v2792_v62 = vmul.f32 %v2253_v53, %v2601_v1  ;;  %v2796_v11 = vmul.f32 %v2253_v53, %v2604_v2  ;;  %v2799_v12 = vmul.f32 %v2253_v53, %v2607_v3 }
  0xde   : > { %v2802_v32 = vmul.f32 %v2255_v4, %v2622_v9  ;;  %v2807_v15 = vmul.f32 %v2255_v4, %v2625_v10  ;;  %v2257_v1 = vpop.eup %2256  ;;  %v531_v2 = vsel %vm530_vm2, %v2721_v40, %v529_v5  ;;  %v335_v36 = vmul.f32 %v334_v6, %v2735_v56 }
  0xdf   : > { %v580_v14 = vsub.f32 0.0, %v2789_v61  ;;  %v581_v0 = vsub.f32 0.0, %v2792_v62  ;;  %v582_v16 = vsub.f32 0.0, %v2796_v11  ;;  %v583_v3 = vsub.f32 0.0, %v2799_v12 }
  0xe0   : > { %v574_v9 = vsub.f32 0.0, %v2802_v32  ;;  %v534_v19 = vsel %vm532_vm3, %v533_v54, %v531_v2  ;;  %v370_v20 = vmul.f32 %v2257_v1, %v2771_v45  ;;  %v2820_v27 = vmul.f32 %v2255_v4, %v2616_v7 }
  0xe1   : > { %v604_v10 = vmul.f32 1.442695, %v580_v14  ;;  %v535_v21 = vadd.f32 0.0001, %v534_v19  ;;  %v606_v22 = vmul.f32 1.442695, %v581_v0  ;;  %v337_v28 = vsel %vm336_vm4, %v2735_v56, %v335_v36 }
  0xe2   : > { %v608_v26 = vmul.f32 1.442695, %v582_v16  ;;  %v371_v29 = vmul.f32 %v2257_v1, %v370_v20  ;;  %v610_v30 = vmul.f32 1.442695, %v583_v3  ;;  %v340_v41 = vsel %vm338_vm5, %v339_v47, %v337_v28 }
  0xe3   : > { %2258 = vpow2.f32 %v604_v10  ;;  %v551_v40 = vsel %vm539_vm15, %v535_v21, %v511_v59  ;;  %v575_v33 = vsub.f32 0.0, %v2807_v15  ;;  %v592_v7 = vmul.f32 1.442695, %v574_v9 }
  0xe4   : > { %2260 = vpow2.f32 %v606_v22  ;;  %v372_v34 = vmul.f32 0.5, %v371_v29  ;;  %v572_v43 = vsub.f32 0.0, %v2820_v27  ;;  %v341_v38 = vadd.f32 0.0001, %v340_v41 }
  0xe5   : > { %2262 = vrcp.f32 %v551_v40  ;;  %v594_v37 = vmul.f32 1.442695, %v575_v33  ;;  %v2837_v49 = vmul.f32 %v2255_v4, %v2619_v8  ;;  %vm742_vm15 = vcmask 1039360  }
  0xe6   : > { %2264 = vpow2.f32 %v608_v26  ;;  %v373_v39 = vsub.f32 1.5, %v372_v34  ;;  %v588_v63 = vmul.f32 1.442695, %v572_v43  ;;  %v355_v51 = vsel %vm347_vm6, %v341_v38, 0.0 }
  0xe7   : > { %2266 = vpow2.f32 %v610_v30  ;;  %v573_v19 = vsub.f32 0.0, %v2837_v49  ;;  %vm1018_vm1 = vcmask 883712   ;;  %vm1628_vm2 = vcmask 261120  }
  0xe8   : > { %v374_v42 = vmul.f32 %v2257_v1, %v373_v39  ;;  %2268 = vpow2.f32 %v592_v7  ;;  %vm949_vm3 = vcmask 891904  }
  0xe9   : > { %v2259_v56 = vpop.eup %2258  ;;  %2270 = vpow2.f32 %v594_v37  ;;  %v590_v30 = vmul.f32 1.442695, %v573_v19 }
  0xea   : > { %v2261_v57 = vpop.eup %2260  ;;  %v628_v46 = vadd.f32 1.0, %v2259_v56  ;;  %v375_v52 = vmul.f32 %v374_v42, %v2771_v45  ;;  %2272 = vpow2.f32 %v588_v63 }
  0xeb   : > { %v2263_v50 = vpop.eup %2262  ;;  %v629_v54 = vadd.f32 1.0, %v2261_v57 }
  0xec   : > { %v2265_v55 = vpop.eup %2264  ;;  %2274 = vrcp.f32 %v628_v46  ;;  %v2841_v53 = vmul.f32 %v2263_v50, %v2632_v13  ;;  %v2844_v58 = vmul.f32 %v2263_v50, %v2639_v17  ;;  %v2847_v47 = vmul.f32 %v2263_v50, %v2642_v18 }
  0xed   : > { %v2267_v59 = vpop.eup %2266  ;;  %v377_v8 = vsel %vm376_vm8, %v2771_v45, %v375_v52  ;;  %2276 = vrcp.f32 %v629_v54  ;;  %v630_v4 = vadd.f32 1.0, %v2265_v55  ;;  %v2853_v60 = vmul.f32 %v2263_v50, %v2666_v31 }
  0xee   : > { %v380_v13 = vsel %vm378_vm9, %v379_v44, %v377_v8  ;;  %v631_v5 = vadd.f32 1.0, %v2267_v59  ;;  %v584_v17 = vsub.f32 0.0, %v2841_v53  ;;  %v585_v6 = vsub.f32 0.0, %v2844_v58  ;;  %v2269_v18 = vpop.eup %2268 }
  0xef   : > { %v381_v14 = vadd.f32 0.0001, %v380_v13  ;;  %2278 = vrcp.f32 %v630_v4  ;;  %v586_v0 = vsub.f32 0.0, %v2847_v47  ;;  %v587_v1 = vsub.f32 0.0, %v2853_v60  ;;  %v2271_v2 = vpop.eup %2270 }
  0xf0   : > { %2280 = vrcp.f32 %v631_v5  ;;  %v612_v16 = vmul.f32 1.442695, %v584_v17  ;;  %v614_v31 = vmul.f32 1.442695, %v585_v6  ;;  %v2273_v3 = vpop.eup %2272  ;;  %v622_v22 = vadd.f32 1.0, %v2269_v18 }
  0xf1   : > { %v395_v45 = vsel %vm383_vm7, %v381_v14, %v355_v51  ;;  %v616_v9 = vmul.f32 1.442695, %v586_v0  ;;  %v618_v20 = vmul.f32 1.442695, %v587_v1  ;;  %v623_v28 = vadd.f32 1.0, %v2271_v2 }
  0xf2   : > { %v2275_v36 = vpop.eup %2274  ;;  %2282 = vrcp.f32 %v395_v45  ;;  %v620_v34 = vadd.f32 1.0, %v2273_v3 }
  0xf3   : > { %v2277_v10 = vpop.eup %2276  ;;  %v660_v21 = vmul.f32 %v2275_v36, %v2789_v61  ;;  %2284 = vpow2.f32 %v612_v16 }
  0xf4   : > { %v661_v26 = vmul.f32 %v2277_v10, %v2792_v62  ;;  %2286 = vpow2.f32 %v614_v31 }
  0xf5   : > { %v2279_v29 = vpop.eup %2278  ;;  %2288 = vpow2.f32 %v616_v9 }
  0xf6   : > { %v2281_v48 = vpop.eup %2280  ;;  %v2866_v40 = vpack.c.bf16 %v661_v26, %v660_v21  ;;  %v662_v41 = vmul.f32 %v2279_v29, %v2796_v11  ;;  %2290 = vpow2.f32 %v618_v20 }
  0xf7   : > { %v663_v33 = vmul.f32 %v2281_v48, %v2799_v12  ;;  %2292 = vrcp.f32 %v622_v22 }
  0xf8   : > { %v2283_v61 = vpop.eup %2282  ;;  %680 = vst [vmem:[#allocation2 + $0x8] sm:$0xff] %v2866_v40  ;;  %863 = vrot.lane.b32.xlu2 %v2866_v40, %s2463_s15  ;;  %2294 = vrcp.f32 %v623_v28 }
  0xf9   : > { %v2285_v62 = vpop.eup %2284  ;;  %v2873_v7 = vpack.c.bf16 %v663_v33, %v662_v41  ;;  %2296 = vpow2.f32 %v590_v30  ;;  %v2876_v37 = vmul.f32 %v2283_v61, %v2651_v23  ;;  %v2879_v11 = vmul.f32 %v2283_v61, %v2654_v24 }
  0xfa   : > { %v2287_v12 = vpop.eup %2286  ;;  %v632_v43 = vadd.f32 1.0, %v2285_v62  ;;  %v2882_v38 = vmul.f32 %v2283_v61, %v2657_v25  ;;  %v2885_v39 = vmul.f32 %v2283_v61, %v2671_v35  ;;  %2298 = vrcp.f32 %v620_v34 }
  0xfb   : > { %v2289_v63 = vpop.eup %2288  ;;  %681 = vst [vmem:[#allocation2 + $0x20] sm:$0xff] %v2873_v7  ;;  %v633_v56 = vadd.f32 1.0, %v2287_v12  ;;  %v576_v42 = vsub.f32 0.0, %v2876_v37  ;;  %v577_v23 = vsub.f32 0.0, %v2879_v11 }
  0xfc   : > { %v2291_v57 = vpop.eup %2290  ;;  %2300 = vrcp.f32 %v632_v43  ;;  %v634_v24 = vadd.f32 1.0, %v2289_v63  ;;  %v578_v44 = vsub.f32 0.0, %v2882_v38  ;;  %v579_v25 = vsub.f32 0.0, %v2885_v39 }
  0xfd   : > { %v2293_v46 = vpop.eup %2292  ;;  %2302 = vrcp.f32 %v633_v56  ;;  %v635_v35 = vadd.f32 1.0, %v2291_v57  ;;  %v596_v50 = vmul.f32 1.442695, %v576_v42  ;;  %v598_v51 = vmul.f32 1.442695, %v577_v23 }
  0xfe   : > { %v2295_v52 = vpop.eup %2294  ;;  %2304 = vrcp.f32 %v634_v24  ;;  %v654_v54 = vmul.f32 %v2293_v46, %v2802_v32  ;;  %v600_v8 = vmul.f32 1.442695, %v578_v44  ;;  %v602_v5 = vmul.f32 1.442695, %v579_v25 }
  0xff   : > { %v2297_v55 = vpop.eup %2296  ;;  %2306 = vrcp.f32 %v635_v35  ;;  %v655_v59 = vmul.f32 %v2295_v52, %v2807_v15  ;;  %v688_v4 = vld [vmem:[#allocation2 + $0x8] sm:$0xff] }
 0x100   : > { %865 = vrot.lane.b32.xlu2 %v2873_v7, %s2463_s15  ;;  %v621_v13 = vadd.f32 1.0, %v2297_v55  ;;  %2308 = vpow2.f32 %v596_v50  ;;  %696 = vst [vmem:[#allocation3 + $0x18] sm:$0xff] %v688_v4  ;;  %v2299_v17 = vpop.eup %2298 }
 0x101   : > { %v2896_v6 = vpack.c.bf16 %v655_v59, %v654_v54  ;;  %2310 = vpow2.f32 %v598_v51  ;;  %v652_v19 = vmul.f32 %v2299_v17, %v2820_v27 }
 0x102   : > { %v2301_v18 = vpop.eup %2300  ;;  %2312 = vrcp.f32 %v621_v13  ;;  %v689_v32 = vld [vmem:[#allocation2 + $0x20] sm:$0xf] }
 0x103   : > { %v2303_v14 = vpop.eup %2302  ;;  %v664_v0 = vmul.f32 %v2301_v18, %v2841_v53  ;;  %677 = vst [vmem:[#allocation2] sm:$0xff] %v2896_v6  ;;  %2314 = vpow2.f32 %v600_v8 }
 0x104   : > { %v2305_v15 = vpop.eup %2304  ;;  %v665_v1 = vmul.f32 %v2303_v14, %v2844_v58  ;;  %2316 = vpow2.f32 %v602_v5  ;;  %697 = vst [vmem:[#allocation3 + $0x20] sm:$0xf] %v689_v32 }
 0x105   : > { %v2307_v2 = vpop.eup %2306  ;;  %v666_v16 = vmul.f32 %v2305_v15, %v2847_v47 }
 0x106   : > { %v2309_v31 = vpop.eup %2308  ;;  %v2902_v3 = vpack.c.bf16 %v665_v1, %v664_v0  ;;  %v667_v45 = vmul.f32 %v2307_v2, %v2853_v60 }
 0x107   : > { %v2311_v9 = vpop.eup %2310  ;;  %v624_v53 = vadd.f32 1.0, %v2309_v31 }
 0x108   : > { %v2313_v36 = vpop.eup %2312  ;;  %682 = vst [vmem:[#allocation2 + $0x28] sm:$0xff] %v2902_v3  ;;  %867 = vrot.lane.b32.xlu0 %v2902_v3, %s2463_s15  ;;  %v2909_v58 = vpack.c.bf16 %v667_v45, %v666_v16  ;;  %1139 = vrot.lane.b32.xlu2 %v2866_v40, %s2464_s20  ;;  %v625_v47 = vadd.f32 1.0, %v2311_v9 }
 0x109   : > { %v2315_v20 = vpop.eup %2314  ;;  %v653_v60 = vmul.f32 %v2313_v36, %v2837_v49  ;;  %2318 = vrcp.f32 %v624_v53 }
 0x10a   : > { %v2317_v10 = vpop.eup %2316  ;;  %683 = vst [vmem:[#allocation2 + $0x38] sm:$0xff] %v2909_v58  ;;  %869 = vrot.lane.b32.xlu1 %v2909_v58, %s2463_s15  ;;  %2320 = vrcp.f32 %v625_v47  ;;  %v626_v27 = vadd.f32 1.0, %v2315_v20  ;;  %v685_v21 = vld [vmem:[#allocation2] sm:$0xf] }
 0x10b   : > { %v2917_v22 = vpack.c.bf16 %v653_v60, %v652_v19  ;;  %v627_v26 = vadd.f32 1.0, %v2317_v10  ;;  %693 = vst [vmem:[#allocation3 + $0x8] sm:$0xf] %v685_v21 }
 0x10c   : > { %2322 = vrcp.f32 %v626_v27 }
 0x10d   : > { %676 = vst [vmem:[#allocation2 + $0x30] sm:$0xff] %v2917_v22  ;;  %2324 = vrcp.f32 %v627_v26 }
 0x10f   : > { %v2319_v28 = vpop.eup %2318  ;;  %v690_v49 = vld [vmem:[#allocation2 + $0x28] sm:$0xff] }
 0x110   : > { %v2321_v29 = vpop.eup %2320  ;;  %1145 = vrot.lane.b32.xlu0 %v2909_v58, %s2464_s20  ;;  %1141 = vrot.lane.b32.xlu2 %v2873_v7, %s2464_s20  ;;  %v656_v30 = vmul.f32 %v2319_v28, %v2876_v37  ;;  %698 = vst [vmem:[#allocation3 + $0x24] sm:$0xff] %v690_v49 }
 0x111   : > { %v657_v48 = vmul.f32 %v2321_v29, %v2879_v11  ;;  %v691_v41 = vld [vmem:[#allocation2 + $0x38] sm:$0xf] }
 0x112   : > { %v2323_v33 = vpop.eup %2322  ;;  %857 = vrot.lane.b32.xlu1 %v2896_v6, %s2463_s15  ;;  %699 = vst [vmem:[#allocation3 + $0x2c] sm:$0xf] %v691_v41 }
 0x113   : > { %v2325_v34 = vpop.eup %2324  ;;  %v2928_v61 = vpack.c.bf16 %v657_v48, %v656_v30  ;;  %v658_v62 = vmul.f32 %v2323_v33, %v2882_v38 }
 0x114   : > { %v659_v12 = vmul.f32 %v2325_v34, %v2885_v39  ;;  %v684_v43 = vld [vmem:[#allocation2 + $0x30] sm:$0xff] }
 0x115   : > { %692 = vst [vmem:[#allocation3] sm:$0xff] %v684_v43 }
 0x116   : > { %v2932_v63 = vpack.c.bf16 %v659_v12, %v658_v62  ;;  %694 = vst [vmem:[#allocation3 + $0xc] sm:$0xff] %v2928_v61 }
 0x118   : > { %859 = vrot.lane.b32.xlu0 %v2928_v61, %s2463_s15  ;;  %1143 = vrot.lane.b32.xlu2 %v2902_v3, %s2464_s20  ;;  %679 = vst [vmem:[#allocation2 + $0x10] sm:$0xff] %v2932_v63 }
 0x11a   : > { %1131 = vrot.lane.b32.xlu1 %v2917_v22, %s2464_s20 }
 0x11f   : > { %v687_v37 = vld [vmem:[#allocation2 + $0x10] sm:$0xf] }
 0x120   : > { %1133 = vrot.lane.b32.xlu0 %v2896_v6, %s2464_s20  ;;  %855 = vrot.lane.b32.xlu2 %v2917_v22, %s2463_s15  ;;  %695 = vst [vmem:[#allocation3 + $0x14] sm:$0xf] %v687_v37 }
 0x122   : > { %1137 = vrot.lane.b32.xlu1 %v2932_v63, %s2464_s20 }
 0x128   : > { %794 = vrot.lane.b32.xlu0 %v2866_v40, %s2465_s8  ;;  %861 = vrot.lane.b32.xlu2 %v2932_v63, %s2463_s15 }
 0x12a   : > { %798 = vrot.lane.b32.xlu1 %v2902_v3, %s2465_s8 }
 0x130   : > { %800 = vrot.lane.b32.xlu0 %v2909_v58, %s2465_s8  ;;  %1135 = vrot.lane.b32.xlu2 %v2928_v61, %s2464_s20 }
 0x132   : > { %1072 = vrot.lane.b32.xlu1 %v2873_v7, %s2466_s17 }
 0x138   : > { %1074 = vrot.lane.b32.xlu0 %v2902_v3, %s2466_s17  ;;  %796 = vrot.lane.b32.xlu2 %v2873_v7, %s2465_s8 }
 0x13a   : > { %1208 = vrot.lane.b32.xlu1 %v2866_v40, %s2467_s18 }
 0x140   : > { %1210 = vrot.lane.b32.xlu0 %v2873_v7, %s2467_s18  ;;  %1070 = vrot.lane.b32.xlu2 %v2866_v40, %s2466_s17 }
 0x142   : > { %1214 = vrot.lane.b32.xlu1 %v2909_v58, %s2467_s18 }
 0x148   : > { %786 = vrot.lane.b32.xlu0 %v2917_v22, %s2465_s8  ;;  %1076 = vrot.lane.b32.xlu2 %v2909_v58, %s2466_s17 }
 0x14a   : > { %790 = vrot.lane.b32.xlu1 %v2928_v61, %s2465_s8 }
 0x150   : > { %792 = vrot.lane.b32.xlu0 %v2932_v63, %s2465_s8  ;;  %1212 = vrot.lane.b32.xlu2 %v2902_v3, %s2467_s18 }
 0x152   : > { %1064 = vrot.lane.b32.xlu1 %v2896_v6, %s2466_s17  ;;  %v864_v11 = vpop.permute.xlu2 %863 }
 0x153   : > { %v875_v39 = vrot.slane %v864_v11, 4 }
 0x158   : > { %1066 = vrot.lane.b32.xlu0 %v2928_v61, %s2466_s17  ;;  %788 = vrot.lane.b32.xlu2 %v2896_v6, %s2465_s8  ;;  %s2406_s8 = scalar_lea.hbm %s3194_s2, 96 }
 0x159   : > { %p2408_p9 = scmp.lt.s32.totalorder %s2406_s8, %s2402_s13 }
 0x15a   : > { %1200 = vrot.lane.b32.xlu1 %v2917_v22, %s2467_s18  ;;  %v866_v38 = vpop.permute.xlu2 %865 }
 0x15b   : > { %v876_v56 = vrot.slane %v866_v38, 4  ;;  %p2409_p2 = por %p2408_p9, %p2407_p11 }
 0x15d   : > { %v886_v42 = vsel %vm243_vm0, %v875_v39, %v876_v56  ;;  %v888_v23 = vsel %vm880_vm10, %v866_v38, %v876_v56  ;;  %p2410_p10 = pnand %p2409_p2, %p2405_p8 }
 0x15e   : > { %v887_v57 = vsel %vm880_vm10, %v864_v11, %v886_v42  ;;  %905 = vst [vmem:[#allocation3 + $0xb0] sm:$0xf] %v888_v23 }
 0x15f   : > { %904 = vst [vmem:[#allocation3 + $0xa8] sm:$0xff] %v887_v57 }
 0x160   : > { %1202 = vrot.lane.b32.xlu0 %v2896_v6, %s2467_s18  ;;  %1062 = vrot.lane.b32.xlu2 %v2917_v22, %s2466_s17 }
 0x162   : > { %1206 = vrot.lane.b32.xlu1 %v2932_v63, %s2467_s18  ;;  %v1140_v24 = vpop.permute.xlu2 %1139 }
 0x163   : > { %v1151_v25 = vrot.slane %v1140_v24, 4 }
 0x166   : > { %v1971_v36 = vld [vmem:[#allocation3 + $0xa8] sm:$0xf]  ;;  %v2132_v47 = vld [vmem:[#allocation3 + $0xac] sm:$0xf] }
 0x168   : > { %724 = vrot.lane.b32.xlu0 %v2866_v40, %s2468_s19  ;;  %1068 = vrot.lane.b32.xlu2 %v2932_v63, %s2466_s17 }
 0x16a   : > { %728 = vrot.lane.b32.xlu1 %v2902_v3, %s2468_s19  ;;  %v1142_v44 = vpop.permute.xlu2 %1141 }
 0x16b   : > { %v1152_v46 = vrot.slane %v1142_v44, 4 }
 0x16d   : > { %v1162_v35 = vsel %vm243_vm0, %v1151_v25, %v1152_v46  ;;  %v1164_v50 = vsel %vm1156_vm11, %v1142_v44, %v1152_v46 }
 0x16e   : > { %v1163_v51 = vsel %vm1156_vm11, %v1140_v24, %v1162_v35  ;;  %1181 = vst [vmem:[#allocation3 + $0x170] sm:$0xf] %v1164_v50 }
 0x16f   : > { %1180 = vst [vmem:[#allocation3 + $0x168] sm:$0xff] %v1163_v51 }
 0x170   : > { %730 = vrot.lane.b32.xlu0 %v2909_v58, %s2468_s19  ;;  %1204 = vrot.lane.b32.xlu2 %v2928_v61, %s2467_s18 }
 0x172   : > { %1003 = vrot.lane.b32.xlu1 %v2873_v7, %s2469_s21  ;;  %v1144_v52 = vpop.permute.xlu2 %1143 }
 0x173   : > { %v1153_v14 = vrot.slane %v1144_v52, 4 }
 0x176   : > { %v2067_v33 = vld [vmem:[#allocation3 + $0x168] sm:$0xf] }
 0x178   : > { %1005 = vrot.lane.b32.xlu0 %v2902_v3, %s2469_s21  ;;  %726 = vrot.lane.b32.xlu2 %v2873_v7, %s2468_s19 }
 0x17a   : > { %716 = vrot.lane.b32.xlu1 %v2917_v22, %s2468_s19  ;;  %v868_v54 = vpop.permute.xlu0 %867  ;;  %v856_v55 = vpop.permute.xlu2 %855 }
 0x17b   : > { %v877_v59 = vrot.slane %v868_v54, 4  ;;  %v871_v15 = vrot.slane %v856_v55, 4 }
 0x17c   : > { %v870_v8 = vpop.permute.xlu1 %869 }
 0x17d   : > { %v878_v4 = vrot.slane %v870_v8, 4 }
 0x17f   : > { %v889_v13 = vsel %vm243_vm0, %v877_v59, %v878_v4  ;;  %v891_v5 = vsel %vm880_vm10, %v870_v8, %v878_v4 }
 0x180   : > { %v890_v17 = vsel %vm880_vm10, %v868_v54, %v889_v13  ;;  %907 = vst [vmem:[#allocation3 + $0xbc] sm:$0xf] %v891_v5  ;;  %718 = vrot.lane.b32.xlu0 %v2896_v6, %s2468_s19  ;;  %1001 = vrot.lane.b32.xlu2 %v2866_v40, %s2469_s21 }
 0x181   : > { %906 = vst [vmem:[#allocation3 + $0xb4] sm:$0xff] %v890_v17 }
 0x182   : > { %722 = vrot.lane.b32.xlu1 %v2932_v63, %s2468_s19  ;;  %v1146_v18 = vpop.permute.xlu0 %1145  ;;  %v862_v32 = vpop.permute.xlu2 %861 }
 0x183   : > { %v1154_v0 = vrot.slane %v1146_v18, 4  ;;  %v874_v1 = vrot.slane %v862_v32, 4 }
 0x184   : > { %v858_v2 = vpop.permute.xlu1 %857 }
 0x185   : > { %v1165_v16 = vsel %vm243_vm0, %v1153_v14, %v1154_v0  ;;  %v1167_v31 = vsel %vm1156_vm11, %v1146_v18, %v1154_v0  ;;  %v872_v45 = vrot.slane %v858_v2, 4  ;;  %v885_v20 = vsel %vm880_vm10, %v862_v32, %v874_v1 }
 0x186   : > { %v1166_v9 = vsel %vm1156_vm11, %v1144_v52, %v1165_v16  ;;  %1183 = vst [vmem:[#allocation3 + $0x17c] sm:$0xf] %v1167_v31 }
 0x187   : > { %1182 = vst [vmem:[#allocation3 + $0x174] sm:$0xff] %v1166_v9  ;;  %v879_v19 = vsel %vm243_vm0, %v871_v15, %v872_v45  ;;  %v882_v53 = vsel %vm880_vm10, %v858_v2, %v872_v45 }
 0x188   : > { %v881_v60 = vsel %vm880_vm10, %v856_v55, %v879_v19  ;;  %901 = vst [vmem:[#allocation3 + $0x98] sm:$0xf] %v882_v53  ;;  %993 = vrot.lane.b32.xlu0 %v2917_v22, %s2469_s21  ;;  %v2133_v10 = vld [vmem:[#allocation3 + $0xb0] sm:$0xf0]  ;;  %v1973_v27 = vld [vmem:[#allocation3 + $0xb4] sm:$0xf0]  ;;  %1007 = vrot.lane.b32.xlu2 %v2909_v58, %s2469_s21 }
 0x189   : > { %900 = vst [vmem:[#allocation3 + $0x90] sm:$0xff] %v881_v60  ;;  %v1972_v21 = vor.u32 %v2133_v10, %v1971_v36  ;;  %v1976_v26 = vor.u32 %v2132_v47, %v1973_v27 }
 0x18a   : > { %997 = vrot.lane.b32.xlu1 %v2928_v61, %s2469_s21  ;;  %903 = vst [vmem:[#allocation3 + $0xa4] sm:$0xf] %v885_v20  ;;  %v860_v28 = vpop.permute.xlu0 %859  ;;  %v1136_v49 = vpop.permute.xlu2 %1135 }
 0x18b   : > { %1632 = vmatpush.bf16.msra.mxu0 %v1972_v21  ;;  %1674 = vmatpush.bf16.msra.mxu3 %v1976_v26  ;;  %v873_v29 = vrot.slane %v860_v28, 4  ;;  %v1149_v11 = vrot.slane %v1136_v49, 4 }
 0x18c   : > { %v1132_v30 = vpop.permute.xlu1 %1131 }
 0x18d   : > { %v883_v48 = vsel %vm243_vm0, %v873_v29, %v874_v1  ;;  %v1147_v37 = vrot.slane %v1132_v30, 4 }
 0x18e   : > { %v884_v41 = vsel %vm880_vm10, %v860_v28, %v883_v48  ;;  %v2157_v34 = vld [vmem:[#allocation3 + $0x170] sm:$0xf0] }
 0x18f   : > { %902 = vst [vmem:[#allocation3 + $0x9c] sm:$0xff] %v884_v41  ;;  %v2068_v62 = vor.u32 %v2157_v34, %v2067_v33 }
 0x190   : > { %999 = vrot.lane.b32.xlu0 %v2932_v63, %s2469_s21  ;;  %720 = vrot.lane.b32.xlu2 %v2928_v61, %s2468_s19  ;;  %v1959_v24 = vld [vmem:[#allocation3 + $0x90] sm:$0xf]  ;;  %v2129_v44 = vld [vmem:[#allocation3 + $0x94] sm:$0xf] }
 0x191   : > { %1646 = vmatpush.bf16.msra.mxu1 %v2068_v62 }
 0x192   : > { %934 = vrot.lane.b32.xlu1 %v2873_v7, %s2470_s22  ;;  %v1134_v12 = vpop.permute.xlu0 %1133  ;;  %v797_v43 = vpop.permute.xlu2 %796 }
 0x193   : > { %v1148_v38 = vrot.slane %v1134_v12, 4  ;;  %v807_v39 = vrot.slane %v797_v43, 4 }
 0x194   : > { %v1138_v56 = vpop.permute.xlu1 %1137 }
 0x195   : > { %v1155_v42 = vsel %vm243_vm0, %v1147_v37, %v1148_v38  ;;  %v1158_v23 = vsel %vm1156_vm11, %v1134_v12, %v1148_v38  ;;  %v1150_v57 = vrot.slane %v1138_v56, 4  ;;  %v819_v35 = vsel %vm811_vm12, %v797_v43, %v807_v39 }
 0x196   : > { %v1157_v25 = vsel %vm1156_vm11, %v1132_v30, %v1155_v42  ;;  %1177 = vst [vmem:[#allocation3 + $0x158] sm:$0xf] %v1158_v23  ;;  %v2130_v46 = vld [vmem:[#allocation3 + $0x98] sm:$0xf0]  ;;  %v1961_v7 = vld [vmem:[#allocation3 + $0x9c] sm:$0xf0] }
 0x197   : > { %1176 = vst [vmem:[#allocation3 + $0x150] sm:$0xff] %v1157_v25  ;;  %v1159_v50 = vsel %vm243_vm0, %v1149_v11, %v1150_v57  ;;  %v1161_v51 = vsel %vm1156_vm11, %v1138_v56, %v1150_v57  ;;  %v1960_v52 = vor.u32 %v2130_v46, %v1959_v24  ;;  %v1964_v54 = vor.u32 %v2129_v44, %v1961_v7 }
 0x198   : > { %v1160_v55 = vsel %vm1156_vm11, %v1136_v49, %v1159_v50  ;;  %1179 = vst [vmem:[#allocation3 + $0x164] sm:$0xf] %v1161_v51  ;;  %936 = vrot.lane.b32.xlu0 %v2902_v3, %s2470_s22  ;;  %995 = vrot.lane.b32.xlu2 %v2896_v6, %s2469_s21 }
 0x199   : > { %1178 = vst [vmem:[#allocation3 + $0x15c] sm:$0xff] %v1160_v55  ;;  %1633 = vmatpush.bf16.msra.mxu0 %v1960_v52  ;;  %1675 = vmatpush.bf16.msra.mxu3 %v1964_v54 }
 0x19a   : > { %924 = vrot.lane.b32.xlu1 %v2917_v22, %s2470_s22  ;;  %836 = vst [vmem:[#allocation3 + $0x80] sm:$0xf] %v819_v35  ;;  %v795_v59 = vpop.permute.xlu0 %794  ;;  %v1071_v8 = vpop.permute.xlu2 %1070 }
 0x19b   : > { %v806_v4 = vrot.slane %v795_v59, 4  ;;  %v1082_v15 = vrot.slane %v1071_v8, 4 }
 0x19c   : > { %v799_v13 = vpop.permute.xlu1 %798 }
 0x19d   : > { %v817_v5 = vsel %vm243_vm0, %v806_v4, %v807_v39  ;;  %v808_v0 = vrot.slane %v799_v13, 4 }
 0x19e   : > { %v818_v17 = vsel %vm811_vm12, %v795_v59, %v817_v5  ;;  %v2055_v18 = vld [vmem:[#allocation3 + $0x150] sm:$0xf] }
 0x19f   : > { %835 = vst [vmem:[#allocation3 + $0x78] sm:$0xff] %v818_v17 }
 0x1a0   : > { %926 = vrot.lane.b32.xlu0 %v2896_v6, %s2470_s22  ;;  %v2154_v3 = vld [vmem:[#allocation3 + $0x158] sm:$0xf0]  ;;  %932 = vrot.lane.b32.xlu2 %v2866_v40, %s2470_s22 }
 0x1a1   : > { %v2056_v32 = vor.u32 %v2154_v3, %v2055_v18 }
 0x1a2   : > { %930 = vrot.lane.b32.xlu1 %v2932_v63, %s2470_s22  ;;  %v801_v22 = vpop.permute.xlu0 %800  ;;  %v1077_v14 = vpop.permute.xlu2 %1076 }
 0x1a3   : > { %1647 = vmatpush.bf16.msra.mxu1 %v2056_v32  ;;  %v809_v1 = vrot.slane %v801_v22, 4  ;;  %v1085_v2 = vrot.slane %v1077_v14, 4 }
 0x1a4   : > { %v1073_v16 = vpop.permute.xlu1 %1072 }
 0x1a5   : > { %v820_v31 = vsel %vm243_vm0, %v808_v0, %v809_v1  ;;  %v822_v6 = vsel %vm811_vm12, %v801_v22, %v809_v1  ;;  %v1083_v45 = vrot.slane %v1073_v16, 4  ;;  %v1098_v19 = vsel %vm1087_vm13, %v1077_v14, %v1085_v2 }
 0x1a6   : > { %v821_v40 = vsel %vm811_vm12, %v799_v13, %v820_v31  ;;  %838 = vst [vmem:[#allocation3 + $0x8c] sm:$0xf] %v822_v6  ;;  %v1947_v27 = vld [vmem:[#allocation3 + $0x78] sm:$0xf]  ;;  %v2126_v28 = vld [vmem:[#allocation3 + $0x7c] sm:$0xf] }
 0x1a7   : > { %837 = vst [vmem:[#allocation3 + $0x84] sm:$0xff] %v821_v40  ;;  %v1093_v63 = vsel %vm243_vm0, %v1082_v15, %v1083_v45  ;;  %v1095_v9 = vsel %vm1087_vm13, %v1073_v16, %v1083_v45 }
 0x1a8   : > { %v1094_v53 = vsel %vm1087_vm13, %v1071_v8, %v1093_v63  ;;  %1112 = vst [vmem:[#allocation3 + $0x140] sm:$0xf] %v1095_v9  ;;  %938 = vrot.lane.b32.xlu2 %v2909_v58, %s2470_s22 }
 0x1a9   : > { %1111 = vst [vmem:[#allocation3 + $0x138] sm:$0xff] %v1094_v53 }
 0x1aa   : > { %1114 = vst [vmem:[#allocation3 + $0x14c] sm:$0xf] %v1098_v19  ;;  %v1075_v36 = vpop.permute.xlu0 %1074  ;;  %v1213_v47 = vpop.permute.xlu2 %1212 }
 0x1ab   : > { %v1084_v20 = vrot.slane %v1075_v36, 4  ;;  %v1222_v33 = vrot.slane %v1213_v47, 4 }
 0x1ac   : > { %v1209_v60 = vpop.permute.xlu1 %1208 }
 0x1ad   : > { %v1096_v10 = vsel %vm243_vm0, %v1084_v20, %v1085_v2  ;;  %v1220_v41 = vrot.slane %v1209_v60, 4 }
 0x1ae   : > { %v1097_v21 = vsel %vm1087_vm13, %v1075_v36, %v1096_v10  ;;  %v2127_v26 = vld [vmem:[#allocation3 + $0x80] sm:$0xf0]  ;;  %v1949_v49 = vld [vmem:[#allocation3 + $0x84] sm:$0xf0] }
 0x1af   : > { %1113 = vst [vmem:[#allocation3 + $0x144] sm:$0xff] %v1097_v21  ;;  %v1948_v29 = vor.u32 %v2127_v26, %v1947_v27  ;;  %v1952_v30 = vor.u32 %v2126_v28, %v1949_v49 }
 0x1b0   : > { %928 = vrot.lane.b32.xlu2 %v2928_v61, %s2470_s22  ;;  %v2043_v39 = vld [vmem:[#allocation3 + $0x138] sm:$0xf] }
 0x1b1   : > { %1634 = vmatpush.bf16.msra.mxu0 %v1948_v29  ;;  %1676 = vmatpush.bf16.msra.mxu3 %v1952_v30 }
 0x1b2   : > { %v1211_v58 = vpop.permute.xlu0 %1210  ;;  %v789_v48 = vpop.permute.xlu2 %788 }
 0x1b3   : > { %v1221_v34 = vrot.slane %v1211_v58, 4  ;;  %v803_v62 = vrot.slane %v789_v48, 4 }
 0x1b4   : > { %v1215_v12 = vpop.permute.xlu1 %1214 }
 0x1b5   : > { %v1231_v43 = vsel %vm243_vm0, %v1220_v41, %v1221_v34  ;;  %v1233_v37 = vsel %vm1225_vm14, %v1211_v58, %v1221_v34  ;;  %v1223_v11 = vrot.slane %v1215_v12, 4  ;;  %v813_v57 = vsel %vm811_vm12, %v789_v48, %v803_v62 }
 0x1b6   : > { %v1232_v38 = vsel %vm1225_vm14, %v1209_v60, %v1231_v43  ;;  %1250 = vst [vmem:[#allocation3 + $0x1a0] sm:$0xf] %v1233_v37  ;;  %v2151_v61 = vld [vmem:[#allocation3 + $0x140] sm:$0xf0] }
 0x1b7   : > { %1249 = vst [vmem:[#allocation3 + $0x198] sm:$0xff] %v1232_v38  ;;  %v1234_v56 = vsel %vm243_vm0, %v1222_v33, %v1223_v11  ;;  %v1236_v42 = vsel %vm1225_vm14, %v1215_v12, %v1223_v11  ;;  %v2044_v23 = vor.u32 %v2151_v61, %v2043_v39 }
 0x1b8   : > { %v1235_v24 = vsel %vm1225_vm14, %v1213_v47, %v1234_v56  ;;  %1252 = vst [vmem:[#allocation3 + $0x1ac] sm:$0xf] %v1236_v42 }
 0x1b9   : > { %1251 = vst [vmem:[#allocation3 + $0x1a4] sm:$0xff] %v1235_v24  ;;  %1648 = vmatpush.bf16.msra.mxu1 %v2044_v23  ;;  %v2069_v23 = vld [vmem:[#allocation3 + $0x174] sm:$0xf0] }
 0x1ba   : > { %832 = vst [vmem:[#allocation3 + $0x68] sm:$0xf] %v813_v57  ;;  %v787_v44 = vpop.permute.xlu0 %786  ;;  %v1063_v25 = vpop.permute.xlu2 %1062 }
 0x1bb   : > { %v802_v46 = vrot.slane %v787_v44, 4  ;;  %v1078_v4 = vrot.slane %v1063_v25, 4 }
 0x1bc   : > { %v791_v7 = vpop.permute.xlu1 %790 }
 0x1bd   : > { %v810_v35 = vsel %vm243_vm0, %v802_v46, %v803_v62  ;;  %v804_v8 = vrot.slane %v791_v7, 4 }
 0x1be   : > { %v812_v50 = vsel %vm811_vm12, %v787_v44, %v810_v35  ;;  %v2091_v51 = vld [vmem:[#allocation3 + $0x198] sm:$0xf]  ;;  %v2156_v44 = vld [vmem:[#allocation3 + $0x16c] sm:$0xf] }
 0x1bf   : > { %831 = vst [vmem:[#allocation3 + $0x60] sm:$0xff] %v812_v50  ;;  %v2072_v46 = vor.u32 %v2156_v44, %v2069_v23 }
 0x1c0   : > { %v2163_v52 = vld [vmem:[#allocation3 + $0x1a0] sm:$0xf0] }
 0x1c1   : > { %v2092_v54 = vor.u32 %v2163_v52, %v2091_v51 }
 0x1c2   : > { %v793_v55 = vpop.permute.xlu0 %792  ;;  %v1069_v59 = vpop.permute.xlu2 %1068 }
 0x1c3   : > { %1666 = vmatpush.bf16.msra.mxu2 %v2092_v54  ;;  %v805_v13 = vrot.slane %v793_v55, 4  ;;  %v1081_v5 = vrot.slane %v1069_v59, 4  ;;  %v2057_v54 = vld [vmem:[#allocation3 + $0x15c] sm:$0xf0] }
 0x1c4   : > { %v1065_v17 = vpop.permute.xlu1 %1064 }
 0x1c5   : > { %v814_v18 = vsel %vm243_vm0, %v804_v8, %v805_v13  ;;  %v816_v3 = vsel %vm811_vm12, %v793_v55, %v805_v13  ;;  %v1079_v32 = vrot.slane %v1065_v17, 4  ;;  %v1092_v15 = vsel %vm1087_vm13, %v1069_v59, %v1081_v5 }
 0x1c6   : > { %v815_v22 = vsel %vm811_vm12, %v791_v7, %v814_v18  ;;  %834 = vst [vmem:[#allocation3 + $0x74] sm:$0xf] %v816_v3  ;;  %v1935_v40 = vld [vmem:[#allocation3 + $0x60] sm:$0xf]  ;;  %v2123_v19 = vld [vmem:[#allocation3 + $0x64] sm:$0xf] }
 0x1c7   : > { %833 = vst [vmem:[#allocation3 + $0x6c] sm:$0xff] %v815_v22  ;;  %v1086_v14 = vsel %vm243_vm0, %v1078_v4, %v1079_v32  ;;  %v1089_v0 = vsel %vm1087_vm13, %v1065_v17, %v1079_v32  ;;  %v2153_v7 = vld [vmem:[#allocation3 + $0x154] sm:$0xf]  ;;  %v2045_v22 = vld [vmem:[#allocation3 + $0x144] sm:$0xf0] }
 0x1c8   : > { %v1088_v1 = vsel %vm1087_vm13, %v1063_v25, %v1086_v14  ;;  %1108 = vst [vmem:[#allocation3 + $0x128] sm:$0xf] %v1089_v0  ;;  %v2060_v17 = vor.u32 %v2153_v7, %v2057_v54  ;;  %v2150_v0 = vld [vmem:[#allocation3 + $0x13c] sm:$0xf] }
 0x1c9   : > { %1107 = vst [vmem:[#allocation3 + $0x120] sm:$0xff] %v1088_v1  ;;  %v2048_v1 = vor.u32 %v2150_v0, %v2045_v22 }
 0x1ca   : > { %1110 = vst [vmem:[#allocation3 + $0x134] sm:$0xf] %v1092_v15  ;;  %v1067_v2 = vpop.permute.xlu0 %1066  ;;  %v1205_v16 = vpop.permute.xlu2 %1204 }
 0x1cb   : > { %v1080_v31 = vrot.slane %v1067_v2, 4  ;;  %v1218_v27 = vrot.slane %v1205_v16, 4 }
 0x1cc   : > { %v1201_v6 = vpop.permute.xlu1 %1200 }
 0x1cd   : > { %v1090_v45 = vsel %vm243_vm0, %v1080_v31, %v1081_v5  ;;  %v1216_v10 = vrot.slane %v1201_v6, 4 }
 0x1ce   : > { %v1091_v63 = vsel %vm1087_vm13, %v1067_v2, %v1090_v45  ;;  %v2124_v9 = vld [vmem:[#allocation3 + $0x68] sm:$0xf0]  ;;  %v1937_v53 = vld [vmem:[#allocation3 + $0x6c] sm:$0xf0] }
 0x1cf   : > { %1109 = vst [vmem:[#allocation3 + $0x12c] sm:$0xff] %v1091_v63  ;;  %v1936_v36 = vor.u32 %v2124_v9, %v1935_v40  ;;  %v1940_v47 = vor.u32 %v2123_v19, %v1937_v53 }
 0x1d0   : > { %v2031_v48 = vld [vmem:[#allocation3 + $0x120] sm:$0xf]  ;;  %v2147_v40 = vld [vmem:[#allocation3 + $0x124] sm:$0xf] }
 0x1d1   : > { %1635 = vmatpush.bf16.msra.mxu0 %v1936_v36  ;;  %1677 = vmatpush.bf16.msra.mxu3 %v1940_v47 }
 0x1d2   : > { %v1203_v20 = vpop.permute.xlu0 %1202  ;;  %v727_v60 = vpop.permute.xlu2 %726 }
 0x1d3   : > { %v1217_v21 = vrot.slane %v1203_v20, 4  ;;  %v737_v26 = vrot.slane %v727_v60, 4 }
 0x1d4   : > { %v1207_v28 = vpop.permute.xlu1 %1206 }
 0x1d5   : > { %v1224_v49 = vsel %vm243_vm0, %v1216_v10, %v1217_v21  ;;  %v1227_v29 = vsel %vm1225_vm14, %v1203_v20, %v1217_v21  ;;  %v1219_v30 = vrot.slane %v1207_v28, 4  ;;  %v750_v12 = vsel %vm742_vm15, %v727_v60, %v737_v26 }
 0x1d6   : > { %v1226_v58 = vsel %vm1225_vm14, %v1201_v6, %v1224_v49  ;;  %1246 = vst [vmem:[#allocation3 + $0x188] sm:$0xf] %v1227_v29  ;;  %v2148_v41 = vld [vmem:[#allocation3 + $0x128] sm:$0xf0]  ;;  %v2033_v31 = vld [vmem:[#allocation3 + $0x12c] sm:$0xf0] }
 0x1d7   : > { %1245 = vst [vmem:[#allocation3 + $0x180] sm:$0xff] %v1226_v58  ;;  %v1228_v33 = vsel %vm243_vm0, %v1218_v27, %v1219_v30  ;;  %v1230_v34 = vsel %vm1225_vm14, %v1207_v28, %v1219_v30  ;;  %v2032_v62 = vor.u32 %v2148_v41, %v2031_v48  ;;  %v2036_v19 = vor.u32 %v2147_v40, %v2033_v31  ;;  %v1889_v40 = vld [vmem:[#allocation3 + $0xc] sm:$0xf0] }
 0x1d8   : > { %v1229_v43 = vsel %vm1225_vm14, %v1205_v16, %v1228_v33  ;;  %1248 = vst [vmem:[#allocation3 + $0x194] sm:$0xf] %v1230_v34 }
 0x1d9   : > { %1247 = vst [vmem:[#allocation3 + $0x18c] sm:$0xff] %v1229_v43  ;;  %1649 = vmatpush.bf16.msra.mxu1 %v2032_v62 }
 0x1da   : > { %767 = vst [vmem:[#allocation3 + $0x50] sm:$0xf] %v750_v12  ;;  %v725_v37 = vpop.permute.xlu0 %724  ;;  %v1002_v11 = vpop.permute.xlu2 %1001 }
 0x1db   : > { %v736_v38 = vrot.slane %v725_v37, 4  ;;  %v1013_v51 = vrot.slane %v1002_v11, 4 }
 0x1dc   : > { %v729_v39 = vpop.permute.xlu1 %728 }
 0x1dd   : > { %v748_v61 = vsel %vm243_vm0, %v736_v38, %v737_v26  ;;  %v738_v50 = vrot.slane %v729_v39, 4 }
 0x1de   : > { %v749_v56 = vsel %vm742_vm15, %v725_v37, %v748_v61  ;;  %v2079_v42 = vld [vmem:[#allocation3 + $0x180] sm:$0xf] }
 0x1df   : > { %766 = vst [vmem:[#allocation3 + $0x48] sm:$0xff] %v749_v56  ;;  %v1883_v56 = vld [vmem:[#allocation7 + $0x8] sm:$0xf] }
 0x1e0   : > { %v2160_v57 = vld [vmem:[#allocation3 + $0x188] sm:$0xf0] }
 0x1e1   : > { %v2080_v24 = vor.u32 %v2160_v57, %v2079_v42  ;;  %v2110_v42 = vld [vmem:[#allocation7 + $0x10] sm:$0xf0] }
 0x1e2   : > { %v731_v25 = vpop.permute.xlu0 %730  ;;  %v1008_v35 = vpop.permute.xlu2 %1007 }
 0x1e3   : > { %1667 = vmatpush.bf16.msra.mxu2 %v2080_v24  ;;  %v739_v52 = vrot.slane %v731_v25, 4  ;;  %v1016_v55 = vrot.slane %v1008_v35, 4  ;;  %v3119_v24 = vor.u32 %v2110_v42, %v1883_v56 }
 0x1e4   : > { %v1004_v59 = vpop.permute.xlu1 %1003 }
 0x1e5   : > { %v751_v8 = vsel %vm243_vm0, %v738_v50, %v739_v52  ;;  %v753_v4 = vsel %vm742_vm15, %v731_v25, %v739_v52  ;;  %v1014_v13 = vrot.slane %v1004_v59, 4  ;;  %v1029_v32 = vsel %vm1018_vm1, %v1008_v35, %v1016_v55 }
 0x1e6   : > { %v752_v5 = vsel %vm742_vm15, %v729_v39, %v751_v8  ;;  %769 = vst [vmem:[#allocation3 + $0x5c] sm:$0xf] %v753_v4  ;;  %v1923_v63 = vld [vmem:[#allocation3 + $0x48] sm:$0xf]  ;;  %v2120_v36 = vld [vmem:[#allocation3 + $0x4c] sm:$0xf]  ;;  %2101 = vmatmul.msk.bf16.vlgmr.msra.gmra.mxu2 %vm1628_vm2, %v3119_v24 }
 0x1e7   : > { %1688 = vmatpush.bf16.msrb.mxu2 %v2072_v46  ;;  %768 = vst [vmem:[#allocation3 + $0x54] sm:$0xff] %v752_v5  ;;  %v1024_v18 = vsel %vm243_vm0, %v1013_v51, %v1014_v13  ;;  %v1026_v3 = vsel %vm1018_vm1, %v1004_v59, %v1014_v13  ;;  %v2115_v59 = vld [vmem:[#allocation3 + $0x20] sm:$0xf0]  ;;  %v1899_v4 = vld [vmem:[#allocation3 + $0x18] sm:$0xf] }
 0x1e8   : > { %v1025_v14 = vsel %vm1018_vm1, %v1002_v11, %v1024_v18  ;;  %1043 = vst [vmem:[#allocation3 + $0x110] sm:$0xf] %v1026_v3  ;;  %v1901_v13 = vld [vmem:[#allocation3 + $0x24] sm:$0xf0]  ;;  %v1900_v0 = vor.u32 %v2115_v59, %v1899_v4 }
 0x1e9   : > { %1042 = vst [vmem:[#allocation3 + $0x108] sm:$0xff] %v1025_v14  ;;  %v2039_v59 = vld [vmem:[#allocation3 + $0x128] sm:$0xf] }
 0x1ea   : > { %1045 = vst [vmem:[#allocation3 + $0x11c] sm:$0xf] %v1029_v32  ;;  %v1006_v15 = vpop.permute.xlu0 %1005  ;;  %v721_v2 = vpop.permute.xlu2 %720  ;;  %v2114_v32 = vld [vmem:[#allocation3 + $0x1c] sm:$0xf] }
 0x1eb   : > { %1689 = vmatpush.bf16.msrb.mxu2 %v2060_v17  ;;  %v1015_v16 = vrot.slane %v1006_v15, 4  ;;  %v734_v28 = vrot.slane %v721_v2, 4 }
 0x1ec   : > { %v717_v6 = vpop.permute.xlu1 %716 }
 0x1ed   : > { %v1027_v45 = vsel %vm243_vm0, %v1015_v16, %v1016_v55  ;;  %v732_v21 = vrot.slane %v717_v6, 4 }
 0x1ee   : > { %v1028_v9 = vsel %vm1018_vm1, %v1006_v15, %v1027_v45  ;;  %v2121_v53 = vld [vmem:[#allocation3 + $0x50] sm:$0xf0]  ;;  %v1925_v47 = vld [vmem:[#allocation3 + $0x54] sm:$0xf0]  ;;  %v1887_v15 = vld [vmem:[#allocation3] sm:$0xf]  ;;  %v1904_v45 = vor.u32 %v2114_v32, %v1901_v13 }
 0x1ef   : > { %1690 = vmatpush.bf16.msrb.mxu2 %v2048_v1  ;;  %1044 = vst [vmem:[#allocation3 + $0x114] sm:$0xff] %v1028_v9  ;;  %v1924_v20 = vor.u32 %v2121_v53, %v1923_v63  ;;  %v1928_v60 = vor.u32 %v2120_v36, %v1925_v47  ;;  %v2112_v1 = vld [vmem:[#allocation3 + $0x8] sm:$0xf0]  ;;  %v2158_v63 = vld [vmem:[#allocation3 + $0x178] sm:$0xf0] }
 0x1f0   : > { %v2019_v41 = vld [vmem:[#allocation3 + $0x108] sm:$0xf]  ;;  %v2144_v33 = vld [vmem:[#allocation3 + $0x10c] sm:$0xf] }
 0x1f1   : > { %1636 = vmatpush.bf16.msra.mxu0 %v1924_v20  ;;  %1678 = vmatpush.bf16.msra.mxu3 %v1928_v60  ;;  %v2093_v53 = vld [vmem:[#allocation3 + $0x1a4] sm:$0xf0]  ;;  %v1875_v60 = vld [vmem:[#allocation7] sm:$0xf] }
 0x1f2   : > { %v719_v10 = vpop.permute.xlu0 %718  ;;  %v996_v27 = vpop.permute.xlu2 %995 }
 0x1f3   : > { %1691 = vmatpush.bf16.msrb.mxu2 %v2036_v19  ;;  %v733_v26 = vrot.slane %v719_v10, 4  ;;  %v1010_v49 = vrot.slane %v996_v27, 4  ;;  %v2162_v19 = vld [vmem:[#allocation3 + $0x19c] sm:$0xf] }
 0x1f4   : > { %v723_v29 = vpop.permute.xlu1 %722 }
 0x1f5   : > { %v741_v30 = vsel %vm243_vm0, %v732_v21, %v733_v26  ;;  %v744_v58 = vsel %vm742_vm15, %v719_v10, %v733_v26  ;;  %v735_v48 = vrot.slane %v723_v29, 4  ;;  %v1020_v43 = vsel %vm1018_vm1, %v996_v27, %v1010_v49  ;;  %v2109_v10 = vld [vmem:[#allocation7 + $0x8] sm:$0xf0] }
 0x1f6   : > { %v743_v34 = vsel %vm742_vm15, %v717_v6, %v741_v30  ;;  %763 = vst [vmem:[#allocation3 + $0x38] sm:$0xf] %v744_v58  ;;  %v2145_v62 = vld [vmem:[#allocation3 + $0x110] sm:$0xf0]  ;;  %v2021_v12 = vld [vmem:[#allocation3 + $0x114] sm:$0xf0]  ;;  %v1888_v21 = vor.u32 %v2112_v1, %v1887_v15 }
 0x1f7   : > { %762 = vst [vmem:[#allocation3 + $0x30] sm:$0xff] %v743_v34  ;;  %v745_v37 = vsel %vm243_vm0, %v734_v28, %v735_v48  ;;  %v747_v11 = vsel %vm742_vm15, %v723_v29, %v735_v48  ;;  %v2020_v38 = vor.u32 %v2145_v62, %v2019_v41  ;;  %v2024_v39 = vor.u32 %v2144_v33, %v2021_v12  ;;  %v2075_v28 = vld [vmem:[#allocation3 + $0x170] sm:$0xf]  ;;  %v2063_v58 = vld [vmem:[#allocation3 + $0x158] sm:$0xf] }
 0x1f8   : > { %v746_v61 = vsel %vm742_vm15, %v721_v2, %v745_v37  ;;  %765 = vst [vmem:[#allocation3 + $0x44] sm:$0xf] %v747_v11  ;;  %v2111_v2 = vld [vmem:[#allocation3 + $0x4] sm:$0xf]  ;;  %v2096_v29 = vor.u32 %v2162_v19, %v2093_v53  ;;  %v2076_v30 = vor.u32 %v2158_v63, %v2075_v28  ;;  %v3132_v41 = vor.u32 %v2109_v10, %v1875_v60  ;;  %v2081_v62 = vld [vmem:[#allocation3 + $0x18c] sm:$0xf0] }
 0x1f9   : > { %764 = vst [vmem:[#allocation3 + $0x3c] sm:$0xff] %v746_v61  ;;  %1650 = vmatpush.bf16.msra.mxu1 %v2020_v38  ;;  %1692 = vmatpush.bf16.msrb.mxu2 %v2024_v39  ;;  %v1892_v26 = vor.u32 %v2111_v2, %v1889_v40  ;;  %v2155_v48 = vld [vmem:[#allocation3 + $0x160] sm:$0xf0]  ;;  %v2146_v2 = vld [vmem:[#allocation3 + $0x118] sm:$0xf0] }
 0x1fa   : > { %v994_v23 = vpop.permute.xlu0 %993  ;;  %1039 = vst [vmem:[#allocation3 + $0xf8] sm:$0xf] %v1020_v43  ;;  %v933_v57 = vpop.permute.xlu2 %932  ;;  %v2159_v34 = vld [vmem:[#allocation3 + $0x184] sm:$0xf]  ;;  %v2064_v39 = vor.u32 %v2155_v48, %v2063_v58  ;;  %v2134_v63 = vld [vmem:[#allocation3 + $0xb8] sm:$0xf0] }
 0x1fb   : > { %v1009_v44 = vrot.slane %v994_v23, 4  ;;  %v944_v3 = vrot.slane %v933_v57, 4  ;;  %v2084_v38 = vor.u32 %v2159_v34, %v2081_v62  ;;  %v1877_v60 = vld [vmem:[#allocation7 + $0xc] sm:$0xf0]  ;;  %v2131_v34 = vld [vmem:[#allocation3 + $0xa0] sm:$0xf0] }
 0x1fc   : > { %v998_v25 = vpop.permute.xlu1 %997 }
 0x1fd   : > { %v1017_v46 = vsel %vm243_vm0, %v1009_v44, %v1010_v49  ;;  %v1011_v17 = vrot.slane %v998_v25, 4  ;;  %v2152_v44 = vld [vmem:[#allocation3 + $0x148] sm:$0xf0] }
 0x1fe   : > { %v1019_v7 = vsel %vm1018_vm1, %v994_v23, %v1017_v46  ;;  %v1911_v35 = vld [vmem:[#allocation3 + $0x30] sm:$0xf]  ;;  %v2117_v50 = vld [vmem:[#allocation3 + $0x34] sm:$0xf]  ;;  %v2051_v46 = vld [vmem:[#allocation3 + $0x140] sm:$0xf] }
 0x1ff   : > { %1038 = vst [vmem:[#allocation3 + $0xf0] sm:$0xff] %v1019_v7 }
 0x200   : > { %v2118_v51 = vld [vmem:[#allocation3 + $0x38] sm:$0xf0]  ;;  %v1913_v52 = vld [vmem:[#allocation3 + $0x3c] sm:$0xf0] }
 0x201   : > { %v1912_v54 = vor.u32 %v2118_v51, %v1911_v35  ;;  %v1916_v55 = vor.u32 %v2117_v50, %v1913_v52  ;;  %v2052_v35 = vor.u32 %v2152_v44, %v2051_v46  ;;  %v2015_v40 = vld [vmem:[#allocation3 + $0xf8] sm:$0xf]  ;;  %v1943_v44 = vld [vmem:[#allocation3 + $0x68] sm:$0xf]  ;;  %v2122_v46 = vld [vmem:[#allocation3 + $0x58] sm:$0xf0] }
 0x202   : > { %v1000_v8 = vpop.permute.xlu0 %999  ;;  %v939_v5 = vpop.permute.xlu2 %938 }
 0x203   : > { %1637 = vmatpush.bf16.msra.mxu0 %v1912_v54  ;;  %1679 = vmatpush.bf16.msra.mxu3 %v1916_v55  ;;  %v1012_v18 = vrot.slane %v1000_v8, 4  ;;  %v947_v22 = vrot.slane %v939_v5, 4  ;;  %v2149_v54 = vld [vmem:[#allocation3 + $0x130] sm:$0xf0] }
 0x204   : > { %v935_v14 = vpop.permute.xlu1 %934 }
 0x205   : > { %v1021_v16 = vsel %vm243_vm0, %v1011_v17, %v1012_v18  ;;  %v1023_v31 = vsel %vm1018_vm1, %v1000_v8, %v1012_v18  ;;  %v945_v6 = vrot.slane %v935_v14, 4  ;;  %v960_v20 = vsel %vm949_vm3, %v939_v5, %v947_v22 }
 0x206   : > { %v1022_v9 = vsel %vm1018_vm1, %v998_v25, %v1021_v16  ;;  %1041 = vst [vmem:[#allocation3 + $0x104] sm:$0xf] %v1023_v31  ;;  %v2007_v37 = vld [vmem:[#allocation3 + $0xf0] sm:$0xf]  ;;  %v2141_v56 = vld [vmem:[#allocation3 + $0xf4] sm:$0xf] }
 0x207   : > { %1040 = vst [vmem:[#allocation3 + $0xfc] sm:$0xff] %v1022_v9  ;;  %v955_v36 = vsel %vm243_vm0, %v944_v3, %v945_v6  ;;  %v957_v47 = vsel %vm949_vm3, %v935_v14, %v945_v6  ;;  %1638 = vmatpush.bf16.msra.mxu0 %v1900_v0  ;;  %1680 = vmatpush.bf16.msra.mxu3 %v1904_v45  ;;  %v2027_v31 = vld [vmem:[#allocation3 + $0x110] sm:$0xf] }
 0x208   : > { %v956_v27 = vsel %vm949_vm3, %v933_v57, %v955_v36  ;;  %974 = vst [vmem:[#allocation3 + $0xe0] sm:$0xf] %v957_v47  ;;  %v2040_v3 = vor.u32 %v2149_v54, %v2039_v59  ;;  %v2028_v6 = vor.u32 %v2146_v2, %v2027_v31  ;;  %v2099_v36 = vld [vmem:[#allocation3 + $0x1a0] sm:$0xf]  ;;  %v2116_v54 = vld [vmem:[#allocation3 + $0x28] sm:$0xf0] }
 0x209   : > { %973 = vst [vmem:[#allocation3 + $0xd8] sm:$0xff] %v956_v27 }
 0x20a   : > { %v937_v49 = vpop.permute.xlu0 %936  ;;  %976 = vst [vmem:[#allocation3 + $0xec] sm:$0xf] %v960_v20  ;;  %v929_v25 = vpop.permute.xlu2 %928  ;;  %v2108_v20 = vld [vmem:[#allocation7 + $0x4] sm:$0xf] }
 0x20b   : > { %1639 = vmatpush.bf16.msra.mxu0 %v1888_v21  ;;  %1681 = vmatpush.bf16.msra.mxu3 %v1892_v26  ;;  %v946_v33 = vrot.slane %v937_v49, 4  ;;  %v942_v52 = vrot.slane %v929_v25, 4  ;;  %v2164_v21 = vld [vmem:[#allocation3 + $0x1a8] sm:$0xf0]  ;;  %v1880_v48 = vor.u32 %v2108_v20, %v1877_v60 }
 0x20c   : > { %v925_v12 = vpop.permute.xlu1 %924 }
 0x20d   : > { %v958_v43 = vsel %vm243_vm0, %v946_v33, %v947_v22  ;;  %v940_v50 = vrot.slane %v925_v12, 4  ;;  %v2143_v45 = vld [vmem:[#allocation3 + $0x100] sm:$0xf0]  ;;  %v2100_v33 = vor.u32 %v2164_v21, %v2099_v36 }
 0x20e   : > { %v959_v11 = vsel %vm949_vm3, %v937_v49, %v958_v43  ;;  %v2142_v61 = vld [vmem:[#allocation3 + $0xf8] sm:$0xf0]  ;;  %v2009_v42 = vld [vmem:[#allocation3 + $0xfc] sm:$0xf0]  ;;  %1640 = vmatmul.bf16.vlgmr.msra.gmra.mxu0 %v3132_v41  ;;  %1682 = vmatmul.bf16.vlgmr.msra.gmra.mxu3 %v3132_v41  ;;  %v2016_v9 = vor.u32 %v2143_v45, %v2015_v40  ;;  %v1979_v49 = vld [vmem:[#allocation3 + $0xb0] sm:$0xf] }
 0x20f   : > { %1708 = vmatpush.bf16.msrb.mxu0 %v2096_v29  ;;  %1730 = vmatpush.bf16.msrb.mxu3 %v2076_v30  ;;  %975 = vst [vmem:[#allocation3 + $0xe4] sm:$0xff] %v959_v11  ;;  %v2008_v23 = vor.u32 %v2142_v61, %v2007_v37  ;;  %v2012_v57 = vor.u32 %v2141_v56, %v2009_v42  ;;  %v2003_v29 = vld [vmem:[#allocation3 + $0xe0] sm:$0xf]  ;;  %v2087_v43 = vld [vmem:[#allocation3 + $0x188] sm:$0xf] }
 0x210   : > { %v1995_v5 = vld [vmem:[#allocation3 + $0xd8] sm:$0xf]  ;;  %v2138_v17 = vld [vmem:[#allocation3 + $0xdc] sm:$0xf]  ;;  %v1980_v30 = vor.u32 %v2134_v63, %v1979_v49  ;;  %v2161_v37 = vld [vmem:[#allocation3 + $0x190] sm:$0xf0] }
 0x211   : > { %1651 = vmatpush.bf16.msra.mxu1 %v2008_v23  ;;  %1693 = vmatpush.bf16.msrb.mxu2 %v2012_v57  ;;  %v2140_v47 = vld [vmem:[#allocation3 + $0xe8] sm:$0xf0]  ;;  %v1967_v11 = vld [vmem:[#allocation3 + $0x98] sm:$0xf]  ;;  %v2088_v61 = vor.u32 %v2161_v37, %v2087_v43  ;;  %v1955_v42 = vld [vmem:[#allocation3 + $0x80] sm:$0xf] }
 0x212   : > { %v927_v7 = vpop.permute.xlu0 %926  ;;  %v2004_v58 = vor.u32 %v2140_v47, %v2003_v29  ;;  %v2128_v56 = vld [vmem:[#allocation3 + $0x88] sm:$0xf0]  ;;  %v2125_v57 = vld [vmem:[#allocation3 + $0x70] sm:$0xf0] }
 0x213   : > { %1709 = vmatpush.bf16.msrb.mxu0 %v2084_v38  ;;  %1731 = vmatpush.bf16.msrb.mxu3 %v2064_v39  ;;  %v941_v51 = vrot.slane %v927_v7, 4  ;;  %v1968_v38 = vor.u32 %v2131_v34, %v1967_v11  ;;  %v1956_v23 = vor.u32 %v2128_v56, %v1955_v42 }
 0x214   : > { %v931_v55 = vpop.permute.xlu1 %930 }
 0x215   : > { %v948_v8 = vsel %vm243_vm0, %v940_v50, %v941_v51  ;;  %v951_v4 = vsel %vm949_vm3, %v927_v7, %v941_v51  ;;  %v943_v13 = vrot.slane %v931_v55, 4  ;;  %v1931_v7 = vld [vmem:[#allocation3 + $0x50] sm:$0xf]  ;;  %v1919_v50 = vld [vmem:[#allocation3 + $0x38] sm:$0xf] }
 0x216   : > { %v950_v18 = vsel %vm949_vm3, %v925_v12, %v948_v8  ;;  %970 = vst [vmem:[#allocation3 + $0xc8] sm:$0xf] %v951_v4  ;;  %v2139_v32 = vld [vmem:[#allocation3 + $0xe0] sm:$0xf0]  ;;  %v1997_v22 = vld [vmem:[#allocation3 + $0xe4] sm:$0xf0] }
 0x217   : > { %1732 = vmatpush.bf16.msrb.mxu3 %v2052_v35  ;;  %969 = vst [vmem:[#allocation3 + $0xc0] sm:$0xff] %v950_v18  ;;  %v952_v14 = vsel %vm243_vm0, %v942_v52, %v943_v13  ;;  %v954_v0 = vsel %vm949_vm3, %v931_v55, %v943_v13  ;;  %v1996_v15 = vor.u32 %v2139_v32, %v1995_v5  ;;  %v2119_v51 = vld [vmem:[#allocation3 + $0x40] sm:$0xf0]  ;;  %v1907_v55 = vld [vmem:[#allocation3 + $0x20] sm:$0xf] }
 0x218   : > { %v2000_v1 = vor.u32 %v2138_v17, %v1997_v22  ;;  %v953_v16 = vsel %vm949_vm3, %v929_v25, %v952_v14  ;;  %972 = vst [vmem:[#allocation3 + $0xd4] sm:$0xf] %v954_v0  ;;  %v1944_v25 = vor.u32 %v2125_v57, %v1943_v44  ;;  %v1932_v35 = vor.u32 %v2122_v46, %v1931_v7  ;;  %v2113_v8 = vld [vmem:[#allocation3 + $0x10] sm:$0xf0]  ;;  %v1895_v4 = vld [vmem:[#allocation3 + $0x8] sm:$0xf] }
 0x219   : > { %971 = vst [vmem:[#allocation3 + $0xcc] sm:$0xff] %v953_v16  ;;  %1652 = vmatpush.bf16.msra.mxu1 %v1996_v15  ;;  %v1920_v52 = vor.u32 %v2119_v51, %v1919_v50  ;;  %v1908_v59 = vor.u32 %v2116_v54, %v1907_v55  ;;  %v1896_v13 = vor.u32 %v2113_v8, %v1895_v4 }
 0x21a   : > { %1694 = vmatpush.bf16.msrb.mxu2 %v2000_v1 }
 0x21b   : > { %1733 = vmatpush.bf16.msrb.mxu3 %v2040_v3 }
 0x21d   : > { %v1991_v62 = vld [vmem:[#allocation3 + $0xc8] sm:$0xf] }
 0x21e   : > { %v1983_v19 = vld [vmem:[#allocation3 + $0xc0] sm:$0xf]  ;;  %v2135_v53 = vld [vmem:[#allocation3 + $0xc4] sm:$0xf]  ;;  %2102 = vmatmul.msk.bf16.vlgmr.msrb.gmra.mxu0 %vm1628_vm2, %v3119_v24 }
 0x21f   : > { %1734 = vmatpush.bf16.msrb.mxu3 %v2028_v6  ;;  %v2137_v12 = vld [vmem:[#allocation3 + $0xd0] sm:$0xf0] }
 0x220   : > { %v2136_v10 = vld [vmem:[#allocation3 + $0xc8] sm:$0xf0]  ;;  %v1985_v27 = vld [vmem:[#allocation3 + $0xcc] sm:$0xf0]  ;;  %v1992_v39 = vor.u32 %v2137_v12, %v1991_v62 }
 0x221   : > { %v1984_v26 = vor.u32 %v2136_v10, %v1983_v19  ;;  %v1988_v28 = vor.u32 %v2135_v53, %v1985_v27 }
 0x223   : > { %1735 = vmatpush.bf16.msrb.mxu3 %v2016_v9  ;;  %1653 = vmatpush.bf16.msra.mxu1 %v1984_v26 }
 0x224   : > { %1695 = vmatpush.bf16.msrb.mxu2 %v1988_v28 }
 0x226   : > { %1654 = vmatmul.bf16.vlgmr.msra.gmra.mxu1 %v1880_v48 }
 0x227   : > { %1716 = vmatpush.bf16.msrb.mxu1 %v1980_v30  ;;  %1736 = vmatpush.bf16.msrb.mxu3 %v2004_v58 }
 0x228   : > { %1750 = vmatpush.bf16.msra.mxu2 %v2100_v33 }
 0x229   : > { %1696 = vmatmul.bf16.vlgmr.msrb.gmra.mxu2 %v1880_v48 }
 0x22b   : > { %1717 = vmatpush.bf16.msrb.mxu1 %v1968_v38  ;;  %1737 = vmatpush.bf16.msrb.mxu3 %v1992_v39 }
 0x22c   : > { %1751 = vmatpush.bf16.msra.mxu2 %v2088_v61 }
 0x22e   : > { %1738 = vmatmul.bf16.vlgmr.msrb.gmra.mxu3 %v1880_v48 }
 0x22f   : > { %1718 = vmatpush.bf16.msrb.mxu1 %v1956_v23 }
 0x233   : > { %1719 = vmatpush.bf16.msrb.mxu1 %v1944_v25 }
 0x237   : > { %1720 = vmatpush.bf16.msrb.mxu1 %v1932_v35 }
 0x239   : > { %2103 = vmatmul.msk.bf16.vlgmr.msra.gmra.mxu2 %vm1628_vm2, %v3119_v24 }
 0x23b   : > { %1721 = vmatpush.bf16.msrb.mxu1 %v1920_v52 }
 0x23f   : > { %1722 = vmatpush.bf16.msrb.mxu1 %v1908_v59 }
 0x243   : > { %1723 = vmatpush.bf16.msrb.mxu1 %v1896_v13 }
 0x246   : > { %1724 = vmatmul.bf16.vlgmr.msrb.gmra.mxu1 %v3132_v41 }
 0x269   : > { %v1669_v17 = vpop.f32.mrf.mxu2 }
 0x271   : > { %v1671_v3 = vpop.f32.mrf.mxu2 }
 0x28b   : > { %v1641_v5 = vpop.f32.mrf.mxu0 }
 0x291   : > { %v1683_v22 = vpop.f32.mrf.mxu3 }
 0x293   : > { %v1643_v18 = vpop.f32.mrf.mxu0 }
 0x299   : > { %v1685_v6 = vpop.f32.mrf.mxu3 }
 0x29b   : > { %v1711_v0 = vpop.f32.mrf.mxu0 }
 0x2a3   : > { %v1655_v32 = vpop.f32.mrf.mxu1  ;;  %v1713_v40 = vpop.f32.mrf.mxu0 }
 0x2a4   : > { %v1656_v24 = vadd.f32 %v1655_v32, %v1641_v5 }
 0x2a6   : > { %v1670_v14 = vadd.f32 %v1669_v17, %v1656_v24 }
 0x2a8   : > { %1758 = vst [vmem:[%s3150_s25] sm:$0xff] %v1670_v14 }
 0x2ab   : > { %v1657_v41 = vpop.f32.mrf.mxu1 }
 0x2ac   : > { %v1697_v15 = vpop.f32.mrf.mxu2  ;;  %v1658_v2 = vadd.f32 %v1657_v41, %v1643_v18 }
 0x2ad   : > { %v1698_v1 = vadd.f32 %v1697_v15, %v1683_v22 }
 0x2ae   : > { %v1672_v31 = vadd.f32 %v1671_v3, %v1658_v2 }
 0x2af   : > { %v1712_v16 = vadd.f32 %v1711_v0, %v1698_v1 }
 0x2b0   : > { %1761 = vst [vmem:[%s3150_s25 + $0x18] sm:$0xff] %v1672_v31 }
 0x2b1   : > { %1759 = vst [vmem:[%s3150_s25 + $0x8] sm:$0xff] %v1712_v16  ;;  %v1739_v19 = vpop.f32.mrf.mxu3 }
 0x2b4   : > { %v1699_v45 = vpop.f32.mrf.mxu2 }
 0x2b5   : > { %v1700_v63 = vadd.f32 %v1699_v45, %v1685_v6 }
 0x2b7   : > { %v1714_v9 = vadd.f32 %v1713_v40, %v1700_v63 }
 0x2b9   : > { %1762 = vst [vmem:[%s3150_s25 + $0x20] sm:$0xff] %v1714_v9  ;;  %v1741_v60 = vpop.f32.mrf.mxu3 }
 0x2bc   : > { %v1753_v53 = vpop.f32.mrf.mxu2 }
 0x2c3   : > { %v1725_v36 = vpop.f32.mrf.mxu1 }
 0x2c4   : > { %v1740_v47 = vadd.f32 %v1739_v19, %v1725_v36  ;;  %v1755_v21 = vpop.f32.mrf.mxu2 }
 0x2c6   : > { %v1754_v20 = vadd.f32 %v1753_v53, %v1740_v47 }
 0x2c8   : > { %1760 = vst [vmem:[%s3150_s25 + $0x10] sm:$0xff] %v1754_v20 }
 0x2cb   : > { %v1727_v10 = vpop.f32.mrf.mxu1 }
 0x2cc   : > { %v1742_v27 = vadd.f32 %v1741_v60, %v1727_v10 }
 0x2ce   : > { %v1756_v26 = vadd.f32 %v1755_v21, %v1742_v27 }
 0x2d0   : > { %1763 = vst [vmem:[%s3150_s25 + $0x28] sm:$0xff] %v1756_v26 }
 0x2d1   : > { %2413 = shalt.err (!%p2410_p10)
}
 0x2d2   : > { %s2471_s5 = smov 384   ;;  %s2472_s19 = smov 24  }
 0x2d3   : > { %2173 = dma.vmem_to_hbm [thread:$0]  (%p2555_p7), %s1778_s4, 768, %s1780_s6, %s1765_s7, %s2471_s5, %s2471_s5, %s2472_s19  }
 0x2d4 PF: > { %s1794_s21 = sand.u32 1, %s2444_s9   ;;  %p3200_p12 = scmp.ge.s32.totalorder %s2456_s12, 2 }
 0x2d5   : > { %s1795_s22 = scalar_lea.sflag [#allocation6], %s1794_s21 }
 0x2d6   : > { %p2184_p13 = pnand %p3200_p12, %p2523_p6 }
 0x2d8   : > { %p2185_p0 = pneg %p2184_p13 }
 0x2da   : > { %2439 = dma.done.wait (%p2185_p0), %s1795_s22, 768  }
 0x2db   : > { %2441 = vsyncadd (%p2185_p0), %s1795_s22, 4294966528  ;;  %p16_p3 = scmp.ge.s32.totalorder %s2541_s23, 4   ;;  %s3201_s9 = smov %s2448_s10 }
 0x2dc   : > { %s3202_s10 = smov %s2452_s11  ;;  %s3203_s11 = smov %s2551_s28 }
 0x2dd   : > { %s3204_s12 = smov %s2541_s23  ;;  %18 = sbr.rel (!%p16_p3) target bundleno = 6 (0x6), region = 77 }
 0x2e2   :  { %1801 = vsyncpa [#allocation5], 1 }
 0x2e3   :  { %1803 = vsyncpa [#allocation5 + $0x1], 1 }
 0x2e4   :  { %1804 = vsyncpa [#allocation8], 1 }
 0x2e5   :  { %1805 = vsyncpa [#allocation6], 1 }
 0x2e6   :  { %1807 = vsyncpa [#allocation6 + $0x1], 1 }

</bundles_post_ra>
